<compile_context>
chip_gen: v7x
topology: tpu7x:2x2x1
jax: 0.10.0
libtpu: 0.0.40
codegen_flags: <defaults>
</compile_context>

<pallas_src>
import jax
import jax.numpy as jnp
from jax.experimental import pallas as pl
from jax.experimental.pallas import tpu as pltpu

INPUT_DIM = 2
HIDDEN_DIM = 64
LATENT_DIM = 2
H2 = HIDDEN_DIM // 2  # 32


def _vae_kernel(
    xT_ref, epsT_ref,
    w_e1_ref, b_e1_ref,       # (64, 2),  (64, 1)
    w_e2_ref, b_e2_ref,       # (32, 64), (32, 1)
    w_head_ref, b_head_ref,   # (4, 32),  (4, 1)   fused mu || log_var
    w_d1_ref, b_d1_ref,       # (32, 2),  (32, 1)
    w_d2_ref, b_d2_ref,       # (64, 32), (64, 1)
    w_d3_ref, b_d3_ref,       # (2, 64),  (2, 1)
    xrecT_ref, zmeanT_ref, zlogvarT_ref,
):
    xT = xT_ref[...]                                     # (2, TILE_B)

    # ---- encoder L1 (K=2): rank-1 VPU FMAs, skip the MXU ---------------------
    h = (w_e1_ref[:, 0:1] * xT[0:1, :]
         + w_e1_ref[:, 1:2] * xT[1:2, :]
         + b_e1_ref[...])
    h = jnp.maximum(h, 0.0)                              # (64, TILE_B)

    # ---- encoder L2: MXU, N = TILE_B fills the lanes -------------------------
    h = jnp.dot(w_e2_ref[...], h, preferred_element_type=jnp.float32) + b_e2_ref[...]
    h = jnp.maximum(h, 0.0)                              # (32, TILE_B)

    # ---- fused latent heads: single (4, 32) @ (32, TILE_B) matmul ------------
    heads = (jnp.dot(w_head_ref[...], h, preferred_element_type=jnp.float32)
             + b_head_ref[...])                          # (4, TILE_B)
    z_mean = heads[0:LATENT_DIM, :]                      # (2, TILE_B)
    z_log_var = heads[LATENT_DIM:2 * LATENT_DIM, :]      # (2, TILE_B)

    # ---- reparameterize: z = mu + eps * exp(0.5 * log_var) (EUP exp) ---------
    z = z_mean + epsT_ref[...] * jnp.exp(0.5 * z_log_var)

    # ---- decoder L1 (K=2): rank-1 VPU FMAs -----------------------------------
    d = (w_d1_ref[:, 0:1] * z[0:1, :]
         + w_d1_ref[:, 1:2] * z[1:2, :]
         + b_d1_ref[...])
    d = jnp.maximum(d, 0.0)                              # (32, TILE_B)

    # ---- decoder L2 / L3: MXU -------------------------------------------------
    d = jnp.dot(w_d2_ref[...], d, preferred_element_type=jnp.float32) + b_d2_ref[...]
    d = jnp.maximum(d, 0.0)                              # (64, TILE_B)
    x_rec = jnp.dot(w_d3_ref[...], d, preferred_element_type=jnp.float32) + b_d3_ref[...]

    # Lane-dense stores (last dim = TILE_B, multiple of 128 -> unmasked vst).
    xrecT_ref[...] = x_rec
    zmeanT_ref[...] = z_mean
    zlogvarT_ref[...] = z_log_var


def vae_forward(x, eps, params, *, tile_b=512):
    """VAE forward: (x_reconstructed, z_mean, z_log_var).

    x:   (B, input_dim) f32
    eps: (B, latent_dim) f32 reparameterization noise
    params: torch-layout weights (out_features, in_features) and (out,) biases.
    """
    assert tile_b % 128 == 0, "tile_b must be a multiple of 128 (lane width)"
    B = x.shape[0]
    num_tiles = pl.cdiv(B, tile_b)
    B_pad = num_tiles * tile_b

    # Transposed, lane-major data; pad the batch (lane) axis to the tile size.
    xT = jnp.asarray(x, jnp.float32).T                   # (2, B)
    epsT = jnp.asarray(eps, jnp.float32).T               # (2, B)
    if B_pad != B:
        pad = ((0, 0), (0, B_pad - B))
        xT = jnp.pad(xT, pad)
        epsT = jnp.pad(epsT, pad)

    def col(b):  # bias as explicit (F, 1) column
        return jnp.asarray(b, jnp.float32).reshape(-1, 1)

    # Fused mu/log_var head: one weight, one matmul.
    w_head = jnp.concatenate([params["w_mu"], params["w_lv"]], axis=0)   # (4, 32)
    b_head = jnp.concatenate([params["b_mu"], params["b_lv"]], axis=0)   # (4,)

    weights = (
        params["w_e1"], col(params["b_e1"]),
        params["w_e2"], col(params["b_e2"]),
        w_head, col(b_head),
        params["w_d1"], col(params["b_d1"]),
        params["w_d2"], col(params["b_d2"]),
        params["w_d3"], col(params["b_d3"]),
    )

    data_spec = lambda rows: pl.BlockSpec((rows, tile_b), lambda i: (0, i))
    const_spec = lambda a: pl.BlockSpec(a.shape, lambda i: (0, 0))  # resident

    in_specs = ([data_spec(INPUT_DIM), data_spec(LATENT_DIM)]
                + [const_spec(w) for w in weights])
    out_specs = (data_spec(INPUT_DIM), data_spec(LATENT_DIM), data_spec(LATENT_DIM))
    out_shape = (
        jax.ShapeDtypeStruct((INPUT_DIM, B_pad), jnp.float32),
        jax.ShapeDtypeStruct((LATENT_DIM, B_pad), jnp.float32),
        jax.ShapeDtypeStruct((LATENT_DIM, B_pad), jnp.float32),
    )

    xrecT, zmeanT, zlogvarT = pl.pallas_call(
        _vae_kernel,
        out_shape=out_shape,
        grid=(num_tiles,),
        in_specs=in_specs,
        out_specs=out_specs,
        compiler_params=pltpu.CompilerParams(
            dimension_semantics=("parallel",)),   # megacore split on v7x
    )(xT, epsT, *weights)

    # Back to (B, F) and drop batch padding.
    return xrecT[:, :B].T, zmeanT[:, :B].T, zlogvarT[:, :B].T


def init_params(key):
    """Deterministic init mirroring nn.Linear shapes (torch layout: (out, in))."""
    dims = [
        ("e1", INPUT_DIM, HIDDEN_DIM),
        ("e2", HIDDEN_DIM, H2),
        ("mu", H2, LATENT_DIM),
        ("lv", H2, LATENT_DIM),
        ("d1", LATENT_DIM, H2),
        ("d2", H2, HIDDEN_DIM),
        ("d3", HIDDEN_DIM, INPUT_DIM),
    ]
    params = {}
    keys = jax.random.split(key, 2 * len(dims))
    for i, (name, fan_in, fan_out) in enumerate(dims):
        bound = 1.0 / jnp.sqrt(jnp.float32(fan_in))
        params[f"w_{name}"] = jax.random.uniform(
            keys[2 * i], (fan_out, fan_in), jnp.float32, -bound, bound)
        params[f"b_{name}"] = jax.random.uniform(
            keys[2 * i + 1], (fan_out,), jnp.float32, -bound, bound)
    return params


def vae_reference(x, eps, p):
    """Pure-JAX reference (features-last, torch-layout weights)."""
    h = jnp.maximum(x @ p["w_e1"].T + p["b_e1"], 0.0)
    h = jnp.maximum(h @ p["w_e2"].T + p["b_e2"], 0.0)
    z_mean = h @ p["w_mu"].T + p["b_mu"]
    z_log_var = h @ p["w_lv"].T + p["b_lv"]
    z = z_mean + eps * jnp.exp(0.5 * z_log_var)
    d = jnp.maximum(z @ p["w_d1"].T + p["b_d1"], 0.0)
    d = jnp.maximum(d @ p["w_d2"].T + p["b_d2"], 0.0)
    x_rec = d @ p["w_d3"].T + p["b_d3"]
    return x_rec, z_mean, z_log_var


if __name__ == "__main__":
    key = jax.random.PRNGKey(0)
    k_param, k_x, k_eps = jax.random.split(key, 3)

    B = 1024       # big enough to exercise the batch grid (2 tiles of 512)
    TILE_B = 512
    params = init_params(k_param)
    x = jax.random.normal(k_x, (B, INPUT_DIM), jnp.float32)
    eps = jax.random.normal(k_eps, (B, LATENT_DIM), jnp.float32)

    x_rec, z_mean, z_log_var = vae_forward(x, eps, params, tile_b=TILE_B)
    jax.block_until_ready((x_rec, z_mean, z_log_var))

    # sanity check against pure-JAX reference
    xr_ref, zm_ref, zlv_ref = vae_reference(x, eps, params)
    assert jnp.allclose(x_rec, xr_ref, atol=1e-4, rtol=1e-4), "x_reconstructed mismatch"
    assert jnp.allclose(z_mean, zm_ref, atol=1e-4, rtol=1e-4), "z_mean mismatch"
    assert jnp.allclose(z_log_var, zlv_ref, atol=1e-4, rtol=1e-4), "z_log_var mismatch"

    print("KERNEL_OK")
</pallas_src>

<mosaic_0001>
module attributes {stable_mosaic.version = 11 : i64} {
  func.func @_vae_kernel(%arg0: i32, %arg1: memref<2x512xf32, #tpu.memory_space<vmem>>, %arg2: memref<2x512xf32, #tpu.memory_space<vmem>>, %arg3: memref<64x2xf32, #tpu.memory_space<vmem>>, %arg4: memref<64x1xf32, #tpu.memory_space<vmem>>, %arg5: memref<32x64xf32, #tpu.memory_space<vmem>>, %arg6: memref<32x1xf32, #tpu.memory_space<vmem>>, %arg7: memref<4x32xf32, #tpu.memory_space<vmem>>, %arg8: memref<4x1xf32, #tpu.memory_space<vmem>>, %arg9: memref<32x2xf32, #tpu.memory_space<vmem>>, %arg10: memref<32x1xf32, #tpu.memory_space<vmem>>, %arg11: memref<64x32xf32, #tpu.memory_space<vmem>>, %arg12: memref<64x1xf32, #tpu.memory_space<vmem>>, %arg13: memref<2x64xf32, #tpu.memory_space<vmem>>, %arg14: memref<2x1xf32, #tpu.memory_space<vmem>>, %arg15: memref<2x512xf32, #tpu.memory_space<vmem>>, %arg16: memref<2x512xf32, #tpu.memory_space<vmem>>, %arg17: memref<2x512xf32, #tpu.memory_space<vmem>>) attributes {dimension_semantics = [#tpu.dimension_semantics<parallel>], iteration_bounds = array<i64: 2>, scalar_prefetch = 0 : i64, scratch_operands = 0 : i64, tpu.core_type = #tpu.core_type<tc>, window_params = [{transform_indices = @transform_0, window_bounds = array<i64: 2, 512>}, {transform_indices = @transform_1, window_bounds = array<i64: 2, 512>}, {pipeline_mode = #tpu.pipeline_mode<synchronous>, transform_indices = @transform_2, window_bounds = array<i64: 64, 2>}, {pipeline_mode = #tpu.pipeline_mode<synchronous>, transform_indices = @transform_3, window_bounds = array<i64: 64, 1>}, {pipeline_mode = #tpu.pipeline_mode<synchronous>, transform_indices = @transform_4, window_bounds = array<i64: 32, 64>}, {pipeline_mode = #tpu.pipeline_mode<synchronous>, transform_indices = @transform_5, window_bounds = array<i64: 32, 1>}, {pipeline_mode = #tpu.pipeline_mode<synchronous>, transform_indices = @transform_6, window_bounds = array<i64: 4, 32>}, {pipeline_mode = #tpu.pipeline_mode<synchronous>, transform_indices = @transform_7, window_bounds = array<i64: 4, 1>}, {pipeline_mode = #tpu.pipeline_mode<synchronous>, transform_indices = @transform_8, window_bounds = array<i64: 32, 2>}, {pipeline_mode = #tpu.pipeline_mode<synchronous>, transform_indices = @transform_9, window_bounds = array<i64: 32, 1>}, {pipeline_mode = #tpu.pipeline_mode<synchronous>, transform_indices = @transform_10, window_bounds = array<i64: 64, 32>}, {pipeline_mode = #tpu.pipeline_mode<synchronous>, transform_indices = @transform_11, window_bounds = array<i64: 64, 1>}, {pipeline_mode = #tpu.pipeline_mode<synchronous>, transform_indices = @transform_12, window_bounds = array<i64: 2, 64>}, {pipeline_mode = #tpu.pipeline_mode<synchronous>, transform_indices = @transform_13, window_bounds = array<i64: 2, 1>}, {transform_indices = @transform_14, window_bounds = array<i64: 2, 512>}, {transform_indices = @transform_15, window_bounds = array<i64: 2, 512>}, {transform_indices = @transform_16, window_bounds = array<i64: 2, 512>}]} {
    %c0 = arith.constant 0 : index
    %c0_0 = arith.constant 0 : index
    %0 = vector.load %arg1[%c0, %c0_0] : memref<2x512xf32, #tpu.memory_space<vmem>>, vector<2x512xf32>
    %c0_1 = arith.constant 0 : index
    %c0_2 = arith.constant 0 : index
    %1 = vector.load %arg3[%c0_1, %c0_2] : memref<64x2xf32, #tpu.memory_space<vmem>>, vector<64x1xf32>
    %2 = vector.extract_strided_slice %0 {offsets = [0, 0], sizes = [1, 512], strides = [1, 1]} : vector<2x512xf32> to vector<1x512xf32>
    %3 = vector.broadcast %1 : vector<64x1xf32> to vector<64x512xf32>
    %4 = vector.broadcast %2 : vector<1x512xf32> to vector<64x512xf32>
    %5 = arith.mulf %3, %4 : vector<64x512xf32>
    %c0_3 = arith.constant 0 : index
    %c1 = arith.constant 1 : index
    %6 = vector.load %arg3[%c0_3, %c1] : memref<64x2xf32, #tpu.memory_space<vmem>>, vector<64x1xf32>
    %7 = vector.extract_strided_slice %0 {offsets = [1, 0], sizes = [1, 512], strides = [1, 1]} : vector<2x512xf32> to vector<1x512xf32>
    %8 = vector.broadcast %6 : vector<64x1xf32> to vector<64x512xf32>
    %9 = vector.broadcast %7 : vector<1x512xf32> to vector<64x512xf32>
    %10 = arith.mulf %8, %9 : vector<64x512xf32>
    %11 = arith.addf %5, %10 : vector<64x512xf32>
    %c0_4 = arith.constant 0 : index
    %c0_5 = arith.constant 0 : index
    %12 = vector.load %arg4[%c0_4, %c0_5] : memref<64x1xf32, #tpu.memory_space<vmem>>, vector<64x1xf32>
    %13 = vector.broadcast %12 : vector<64x1xf32> to vector<64x512xf32>
    %14 = arith.addf %11, %13 : vector<64x512xf32>
    %cst = arith.constant 0.000000e+00 : f32
    %15 = vector.broadcast %cst : f32 to vector<64x512xf32>
    %16 = arith.maximumf %14, %15 : vector<64x512xf32>
    %c0_6 = arith.constant 0 : index
    %c0_7 = arith.constant 0 : index
    %17 = vector.load %arg5[%c0_6, %c0_7] : memref<32x64xf32, #tpu.memory_space<vmem>>, vector<32x64xf32>
    %cst_8 = arith.constant dense<0.000000e+00> : vector<32x512xf32>
    %18 = tpu.matmul %17, %16, %cst_8 {dimension_numbers = #tpu.dot_dimension_numbers<[1], [0], [0], [1], [0, 0, 1, 1], [], []>} : vector<32x64xf32>, vector<64x512xf32>, vector<32x512xf32> -> vector<32x512xf32>
    %c0_9 = arith.constant 0 : index
    %c0_10 = arith.constant 0 : index
    %19 = vector.load %arg6[%c0_9, %c0_10] : memref<32x1xf32, #tpu.memory_space<vmem>>, vector<32x1xf32>
    %20 = vector.broadcast %19 : vector<32x1xf32> to vector<32x512xf32>
    %21 = arith.addf %18, %20 : vector<32x512xf32>
    %cst_11 = arith.constant 0.000000e+00 : f32
    %22 = vector.broadcast %cst_11 : f32 to vector<32x512xf32>
    %23 = arith.maximumf %21, %22 : vector<32x512xf32>
    %c0_12 = arith.constant 0 : index
    %c0_13 = arith.constant 0 : index
    %24 = vector.load %arg7[%c0_12, %c0_13] : memref<4x32xf32, #tpu.memory_space<vmem>>, vector<4x32xf32>
    %cst_14 = arith.constant dense<0.000000e+00> : vector<4x512xf32>
    %25 = tpu.matmul %24, %23, %cst_14 {dimension_numbers = #tpu.dot_dimension_numbers<[1], [0], [0], [1], [0, 0, 1, 1], [], []>} : vector<4x32xf32>, vector<32x512xf32>, vector<4x512xf32> -> vector<4x512xf32>
    %c0_15 = arith.constant 0 : index
    %c0_16 = arith.constant 0 : index
    %26 = vector.load %arg8[%c0_15, %c0_16] : memref<4x1xf32, #tpu.memory_space<vmem>>, vector<4x1xf32>
    %27 = vector.broadcast %26 : vector<4x1xf32> to vector<4x512xf32>
    %28 = arith.addf %25, %27 : vector<4x512xf32>
    %29 = vector.extract_strided_slice %28 {offsets = [0, 0], sizes = [2, 512], strides = [1, 1]} : vector<4x512xf32> to vector<2x512xf32>
    %30 = vector.extract_strided_slice %28 {offsets = [2, 0], sizes = [2, 512], strides = [1, 1]} : vector<4x512xf32> to vector<2x512xf32>
    %c0_17 = arith.constant 0 : index
    %c0_18 = arith.constant 0 : index
    %31 = vector.load %arg2[%c0_17, %c0_18] : memref<2x512xf32, #tpu.memory_space<vmem>>, vector<2x512xf32>
    %cst_19 = arith.constant 5.000000e-01 : f32
    %32 = vector.broadcast %cst_19 : f32 to vector<2x512xf32>
    %33 = arith.mulf %32, %30 : vector<2x512xf32>
    %34 = math.exp %33 : vector<2x512xf32>
    %35 = arith.mulf %31, %34 : vector<2x512xf32>
    %36 = arith.addf %29, %35 : vector<2x512xf32>
    %c0_20 = arith.constant 0 : index
    %c0_21 = arith.constant 0 : index
    %37 = vector.load %arg9[%c0_20, %c0_21] : memref<32x2xf32, #tpu.memory_space<vmem>>, vector<32x1xf32>
    %38 = vector.extract_strided_slice %36 {offsets = [0, 0], sizes = [1, 512], strides = [1, 1]} : vector<2x512xf32> to vector<1x512xf32>
    %39 = vector.broadcast %37 : vector<32x1xf32> to vector<32x512xf32>
    %40 = vector.broadcast %38 : vector<1x512xf32> to vector<32x512xf32>
    %41 = arith.mulf %39, %40 : vector<32x512xf32>
    %c0_22 = arith.constant 0 : index
    %c1_23 = arith.constant 1 : index
    %42 = vector.load %arg9[%c0_22, %c1_23] : memref<32x2xf32, #tpu.memory_space<vmem>>, vector<32x1xf32>
    %43 = vector.extract_strided_slice %36 {offsets = [1, 0], sizes = [1, 512], strides = [1, 1]} : vector<2x512xf32> to vector<1x512xf32>
    %44 = vector.broadcast %42 : vector<32x1xf32> to vector<32x512xf32>
    %45 = vector.broadcast %43 : vector<1x512xf32> to vector<32x512xf32>
    %46 = arith.mulf %44, %45 : vector<32x512xf32>
    %47 = arith.addf %41, %46 : vector<32x512xf32>
    %c0_24 = arith.constant 0 : index
    %c0_25 = arith.constant 0 : index
    %48 = vector.load %arg10[%c0_24, %c0_25] : memref<32x1xf32, #tpu.memory_space<vmem>>, vector<32x1xf32>
    %49 = vector.broadcast %48 : vector<32x1xf32> to vector<32x512xf32>
    %50 = arith.addf %47, %49 : vector<32x512xf32>
    %cst_26 = arith.constant 0.000000e+00 : f32
    %51 = vector.broadcast %cst_26 : f32 to vector<32x512xf32>
    %52 = arith.maximumf %50, %51 : vector<32x512xf32>
    %c0_27 = arith.constant 0 : index
    %c0_28 = arith.constant 0 : index
    %53 = vector.load %arg11[%c0_27, %c0_28] : memref<64x32xf32, #tpu.memory_space<vmem>>, vector<64x32xf32>
    %cst_29 = arith.constant dense<0.000000e+00> : vector<64x512xf32>
    %54 = tpu.matmul %53, %52, %cst_29 {dimension_numbers = #tpu.dot_dimension_numbers<[1], [0], [0], [1], [0, 0, 1, 1], [], []>} : vector<64x32xf32>, vector<32x512xf32>, vector<64x512xf32> -> vector<64x512xf32>
    %c0_30 = arith.constant 0 : index
    %c0_31 = arith.constant 0 : index
    %55 = vector.load %arg12[%c0_30, %c0_31] : memref<64x1xf32, #tpu.memory_space<vmem>>, vector<64x1xf32>
    %56 = vector.broadcast %55 : vector<64x1xf32> to vector<64x512xf32>
    %57 = arith.addf %54, %56 : vector<64x512xf32>
    %cst_32 = arith.constant 0.000000e+00 : f32
    %58 = vector.broadcast %cst_32 : f32 to vector<64x512xf32>
    %59 = arith.maximumf %57, %58 : vector<64x512xf32>
    %c0_33 = arith.constant 0 : index
    %c0_34 = arith.constant 0 : index
    %60 = vector.load %arg13[%c0_33, %c0_34] : memref<2x64xf32, #tpu.memory_space<vmem>>, vector<2x64xf32>
    %cst_35 = arith.constant dense<0.000000e+00> : vector<2x512xf32>
    %61 = tpu.matmul %60, %59, %cst_35 {dimension_numbers = #tpu.dot_dimension_numbers<[1], [0], [0], [1], [0, 0, 1, 1], [], []>} : vector<2x64xf32>, vector<64x512xf32>, vector<2x512xf32> -> vector<2x512xf32>
    %c0_36 = arith.constant 0 : index
    %c0_37 = arith.constant 0 : index
    %62 = vector.load %arg14[%c0_36, %c0_37] : memref<2x1xf32, #tpu.memory_space<vmem>>, vector<2x1xf32>
    %63 = vector.broadcast %62 : vector<2x1xf32> to vector<2x512xf32>
    %64 = arith.addf %61, %63 : vector<2x512xf32>
    %c0_38 = arith.constant 0 : index
    %c0_39 = arith.constant 0 : index
    %65 = vector.load %arg15[%c0_38, %c0_39] : memref<2x512xf32, #tpu.memory_space<vmem>>, vector<2x512xf32>
    tpu.vector_store %arg15[%c0_38, %c0_39], %64 {strides = array<i32>} : memref<2x512xf32, #tpu.memory_space<vmem>>, vector<2x512xf32>,
    %c0_40 = arith.constant 0 : index
    %c0_41 = arith.constant 0 : index
    %66 = vector.load %arg16[%c0_40, %c0_41] : memref<2x512xf32, #tpu.memory_space<vmem>>, vector<2x512xf32>
    tpu.vector_store %arg16[%c0_40, %c0_41], %29 {strides = array<i32>} : memref<2x512xf32, #tpu.memory_space<vmem>>, vector<2x512xf32>,
    %c0_42 = arith.constant 0 : index
    %c0_43 = arith.constant 0 : index
    %67 = vector.load %arg17[%c0_42, %c0_43] : memref<2x512xf32, #tpu.memory_space<vmem>>, vector<2x512xf32>
    tpu.vector_store %arg17[%c0_42, %c0_43], %30 {strides = array<i32>} : memref<2x512xf32, #tpu.memory_space<vmem>>, vector<2x512xf32>,
    return
  }
  func.func @transform_0(%arg0: i32) -> (i32, i32) {
    %c0_i32 = arith.constant 0 : i32
    %c0_i32_0 = arith.constant 0 : i32
    return %c0_i32, %arg0 : i32, i32
  }
  func.func @transform_1(%arg0: i32) -> (i32, i32) {
    %c0_i32 = arith.constant 0 : i32
    %c0_i32_0 = arith.constant 0 : i32
    return %c0_i32, %arg0 : i32, i32
  }
  func.func @transform_2(%arg0: i32) -> (i32, i32) {
    %c0_i32 = arith.constant 0 : i32
    %c0_i32_0 = arith.constant 0 : i32
    %c0_i32_1 = arith.constant 0 : i32
    return %c0_i32, %c0_i32_0 : i32, i32
  }
  func.func @transform_3(%arg0: i32) -> (i32, i32) {
    %c0_i32 = arith.constant 0 : i32
    %c0_i32_0 = arith.constant 0 : i32
    %c0_i32_1 = arith.constant 0 : i32
    return %c0_i32, %c0_i32_0 : i32, i32
  }
  func.func @transform_4(%arg0: i32) -> (i32, i32) {
    %c0_i32 = arith.constant 0 : i32
    %c0_i32_0 = arith.constant 0 : i32
    %c0_i32_1 = arith.constant 0 : i32
    return %c0_i32, %c0_i32_0 : i32, i32
  }
  func.func @transform_5(%arg0: i32) -> (i32, i32) {
    %c0_i32 = arith.constant 0 : i32
    %c0_i32_0 = arith.constant 0 : i32
    %c0_i32_1 = arith.constant 0 : i32
    return %c0_i32, %c0_i32_0 : i32, i32
  }
  func.func @transform_6(%arg0: i32) -> (i32, i32) {
    %c0_i32 = arith.constant 0 : i32
    %c0_i32_0 = arith.constant 0 : i32
    %c0_i32_1 = arith.constant 0 : i32
    return %c0_i32, %c0_i32_0 : i32, i32
  }
  func.func @transform_7(%arg0: i32) -> (i32, i32) {
    %c0_i32 = arith.constant 0 : i32
    %c0_i32_0 = arith.constant 0 : i32
    %c0_i32_1 = arith.constant 0 : i32
    return %c0_i32, %c0_i32_0 : i32, i32
  }
  func.func @transform_8(%arg0: i32) -> (i32, i32) {
    %c0_i32 = arith.constant 0 : i32
    %c0_i32_0 = arith.constant 0 : i32
    %c0_i32_1 = arith.constant 0 : i32
    return %c0_i32, %c0_i32_0 : i32, i32
  }
  func.func @transform_9(%arg0: i32) -> (i32, i32) {
    %c0_i32 = arith.constant 0 : i32
    %c0_i32_0 = arith.constant 0 : i32
    %c0_i32_1 = arith.constant 0 : i32
    return %c0_i32, %c0_i32_0 : i32, i32
  }
  func.func @transform_10(%arg0: i32) -> (i32, i32) {
    %c0_i32 = arith.constant 0 : i32
    %c0_i32_0 = arith.constant 0 : i32
    %c0_i32_1 = arith.constant 0 : i32
    return %c0_i32, %c0_i32_0 : i32, i32
  }
  func.func @transform_11(%arg0: i32) -> (i32, i32) {
    %c0_i32 = arith.constant 0 : i32
    %c0_i32_0 = arith.constant 0 : i32
    %c0_i32_1 = arith.constant 0 : i32
    return %c0_i32, %c0_i32_0 : i32, i32
  }
  func.func @transform_12(%arg0: i32) -> (i32, i32) {
    %c0_i32 = arith.constant 0 : i32
    %c0_i32_0 = arith.constant 0 : i32
    %c0_i32_1 = arith.constant 0 : i32
    return %c0_i32, %c0_i32_0 : i32, i32
  }
  func.func @transform_13(%arg0: i32) -> (i32, i32) {
    %c0_i32 = arith.constant 0 : i32
    %c0_i32_0 = arith.constant 0 : i32
    %c0_i32_1 = arith.constant 0 : i32
    return %c0_i32, %c0_i32_0 : i32, i32
  }
  func.func @transform_14(%arg0: i32) -> (i32, i32) {
    %c0_i32 = arith.constant 0 : i32
    %c0_i32_0 = arith.constant 0 : i32
    return %c0_i32, %arg0 : i32, i32
  }
  func.func @transform_15(%arg0: i32) -> (i32, i32) {
    %c0_i32 = arith.constant 0 : i32
    %c0_i32_0 = arith.constant 0 : i32
    return %c0_i32, %arg0 : i32, i32
  }
  func.func @transform_16(%arg0: i32) -> (i32, i32) {
    %c0_i32 = arith.constant 0 : i32
    %c0_i32_0 = arith.constant 0 : i32
    return %c0_i32, %arg0 : i32, i32
  }
}

</mosaic_0001>

<bundles_post_ra>
// kernel: tpu_custom_call.1
= control target key start
LH: loop header
LB: loop body
LE: loop exit
PB: predicated region body
PF: predicated region fallthrough
CT: control target
= control target key end

     0   :  { %s3290_s0 = inlined_call_operand.vmem [shape: f32[2,1024], index: 0, kind: input, shape index: {}]   ;;  %s3291_s1 = inlined_call_operand.vmem [shape: f32[2,1024], index: 1, kind: input, shape index: {}]   ;;  %s3292_s2 = inlined_call_operand.vmem [shape: f32[64,2], index: 2, kind: input, shape index: {}]   ;;  %s3293_s3 = inlined_call_operand.vmem [shape: f32[64,1], index: 3, kind: input, shape index: {}]   ;;  %s3294_s4 = inlined_call_operand.vmem [shape: f32[32,64], index: 4, kind: input, shape index: {}]   ;;  %s3295_s5 = inlined_call_operand.vmem [shape: f32[32,1], index: 5, kind: input, shape index: {}]   ;;  %s3296_s6 = inlined_call_operand.vmem [shape: f32[4,32], index: 6, kind: input, shape index: {}]   ;;  %s3297_s7 = inlined_call_operand.vmem [shape: f32[4,1], index: 7, kind: input, shape index: {}]   ;;  %s3298_s8 = inlined_call_operand.vmem [shape: f32[32,2], index: 8, kind: input, shape index: {}]   ;;  %s3299_s9 = inlined_call_operand.vmem [shape: f32[32,1], index: 9, kind: input, shape index: {}]   ;;  %s3300_s10 = inlined_call_operand.vmem [shape: f32[64,32], index: 10, kind: input, shape index: {}]   ;;  %s3301_s11 = inlined_call_operand.vmem [shape: f32[64,1], index: 11, kind: input, shape index: {}]   ;;  %s3302_s12 = inlined_call_operand.vmem [shape: f32[2,64], index: 12, kind: input, shape index: {}]   ;;  %s3303_s13 = inlined_call_operand.vmem [shape: f32[2,1], index: 13, kind: input, shape index: {}]   ;;  %s3304_s14 = inlined_call_operand.hbm [shape: f32[2,1024], index: 14, kind: output, shape index: {0}]   ;;  %s3305_s15 = inlined_call_operand.hbm [shape: f32[2,1024], index: 15, kind: output, shape index: {1}]   ;;  %s3306_s16 = inlined_call_operand.hbm [shape: f32[2,1024], index: 16, kind: output, shape index: {2}]  }
   0x1   :  { %3312 = sst [smem:[#allocation11_spill]] %s3290_s0 }
   0x2   :  { %3313 = sst [smem:[#allocation12_spill]] %s3291_s1 }
   0x3   :  { %3314 = sst [smem:[#allocation13_spill]] %s3292_s2 }
   0x4   :  { %3315 = sst [smem:[#allocation14_spill]] %s3293_s3 }
   0x5   :  { %3316 = sst [smem:[#allocation15_spill]] %s3294_s4 }
   0x6   :  { %3317 = sst [smem:[#allocation16_spill]] %s3295_s5 }
   0x7   :  { %22 = vsyncpa [#allocation3], 0 }
   0x8   :  { %24 = vsyncpa [#allocation3 + $0x1], 0 }
   0x9   :  { %25 = vsyncpa [#allocation5], 0 }
   0xa   :  { %27 = vsyncpa [#allocation5 + $0x1], 0  ;;  %s2719_s21 = smov 0   ;;  %s2721_s22 = smov 0  }
   0xb   :  { %s2723_s23 = smov 0   ;;  %s2725_s24 = smov 0  }
   0xc LB: > { %3318 = sst [smem:[#allocation9_spill]] %s2621_s23  ;;  %s2740_s25 = sadd.s32 4294967295, %s2625_s24   ;;  %s2625_s24 = sphi %s2725_s24, %s3336_s24   ;;  %s2621_s23 = sphi %s2723_s23, %s3333_s23   ;;  %s2617_s22 = sphi %s2721_s22, %s3335_s22   ;;  %s2613_s21 = sphi %s2719_s21, %s3334_s21  }
   0xd   : > { %s3307_s26 = sadd.s32 4294967294, %s2625_s24   ;;  %s2744_s27 = sadd.s32 1, %s2625_s24  }
   0xe   : > { %s344_s28 = sadd.s32 1, %s2621_s23  ;;  %s341_s29 = ssub.s32 %s2625_s24, %s2744_s27 }
   0xf   : > { %p354_p0 = scmp.ne.s32.totalorder %s2621_s23, %s2617_s22  ;;  %p342_p1 = scmp.eq.s32.totalorder %s341_s29, 0 }
  0x10   : > { %p355_p2 = scmp.eq.s32.totalorder %s2740_s25, 1  ;;  %p360_p3 = scmp.ne.s32.totalorder %s2617_s22, %s2613_s21 }
  0x11   : > { %p361_p4 = scmp.eq.s32.totalorder %s3307_s26, 1  ;;  %p2280_p7 = scmp.ge.s32.totalorder %s2625_s24, 1 }
  0x12   : > { %s2757_s30 = scalar_select %p342_p1, %s2621_s23, %s344_s28  }
  0x13   : > { %p2759_p5 = por %p355_p2, %p354_p0  ;;  %p2763_p6 = por %p361_p4, %p360_p3 }
  0x14   : > { %3319 = sst [smem:[#allocation10_spill]] %s2757_s30  ;;  %p485_p8 = scmp.lt.s32.totalorder %s2625_s24, 3 }
  0x16   : > { %p486_p9 = pnand %p2280_p7, %p485_p8 }
  0x17   : > { %s3322_s2 = sld [smem:[#allocation13_spill]] (!%p486_p9)  ;;  %v2627_v2 = vmov (!%p486_p9), 1   ;;  %v2628_v7 = vmov (!%p486_p9), 0   ;;  %s3323_s3 = sld [smem:[#allocation14_spill]] (!%p486_p9)  ;;  %v1163_v16 = vld [vmem:[%s3297_s7] sm:$0xf] (!%p486_p9)  ;;  %v615_v25 = vlaneseq (!%p486_p9) }
  0x18   : > { %489 = sbr.rel (%p486_p9) target bundleno = 1230 (0x4ce), region = 76  ;;  %2481 = vset.pattern.permute.xlu0 (!%p486_p9), %v2627_v2  ;;  %2479 = vset.pattern.permute.xlu1 (!%p486_p9), %v2627_v2  ;;  %s3324_s5 = sld [smem:[#allocation16_spill]] (!%p486_p9)  ;;  %v2629_v23 = vmov (!%p486_p9), 0.0   ;;  %v1377_v24 = vld [vmem:[%s3298_s8] sm:$0xff] (!%p486_p9)  ;;  %vm955_vm0 = vcmask (!%p486_p9), 523264   ;;  %vm1169_vm1 = vcmask (!%p486_p9), 261120  }
  0x19   : > { %1032 = vmatprep.mubr.f32.mxu0 (!%p486_p9), %v2629_v23  ;;  %1121 = vmatprep.mubr.f32.mxu1 (!%p486_p9), %v2629_v23  ;;  %s2284_s23 = sshll.u32 (!%p486_p9), %s2740_s25, 2  ;;  %v2856_v28 = vshrl.u32 (!%p486_p9), %v615_v25, 7  ;;  %s3325_s18 = sld [smem:[#allocation11_spill]] (!%p486_p9) }
  0x1a   : > { %p551_p10 = scmp.lt.s32.totalorder (!%p486_p9), %s2284_s23, 7  ;;  %s3326_s4 = sld [smem:[#allocation15_spill]] (!%p486_p9) }
  0x1b   : > { %v721_v31 = vsub.s32 (!%p486_p9), 3, %v2856_v28  ;;  %v729_v32 = vsub.s32 (!%p486_p9), 7, %v2856_v28  ;;  %v621_v33 = vsub.s32 (!%p486_p9), 2, %v2856_v28  ;;  %v629_v34 = vsub.s32 (!%p486_p9), 6, %v2856_v28  ;;  %s3310_s30 = sand.u32 (!%p486_p9), 1, %s2617_s22   ;;  %s3328_s1 = sld [smem:[#allocation12_spill]] (!%p486_p9) }
  0x1c   : > { %v2870_v35 = vsub.s32 (!%p486_p9), 1, %v2856_v28  ;;  %v725_v36 = vsub.s32 (!%p486_p9), 5, %v2856_v28  ;;  %v2876_v39 = vsub.s32 (!%p486_p9), 0, %v2856_v28  ;;  %v625_v40 = vsub.s32 (!%p486_p9), 4, %v2856_v28  ;;  %s3091_s28 = sshll.u32 (!%p486_p9), %s3310_s30, 3  ;;  %s3181_s20 = sshll.u32 (!%p486_p9), %s2740_s25, 7 }
  0x1d   : > { %v568_v0 = vld [vmem:[%s3322_s2 + $0x10] sm:$0xff] (!%p486_p9)  ;;  %v566_v1 = vld [vmem:[%s3322_s2] sm:$0xff] (!%p486_p9)  ;;  %v567_v4 = vld [vmem:[%s3322_s2 + $0x8] sm:$0xff] (!%p486_p9) }
  0x1e   : > { %692 = vperm.xlu0 (!%p486_p9), %2481, %v568_v0   ;;  %684 = vperm.xlu1 (!%p486_p9), %2479, %v566_v1   ;;  %v570_v3 = vld [vmem:[%s3322_s2 + $0x20] sm:$0xff] (!%p486_p9)  ;;  %v572_v5 = vld [vmem:[%s3322_s2 + $0x30] sm:$0xff] (!%p486_p9)  ;;  %v569_v6 = vld [vmem:[%s3322_s2 + $0x18] sm:$0xff] (!%p486_p9) }
  0x1f   : > { %v815_v8 = vld [vmem:[%s3323_s3] sm:$0xff]  ;;  %v816_v9 = vld [vmem:[%s3323_s3 + $0x8] sm:$0xff]  ;;  %v818_v11 = vld [vmem:[%s3323_s3 + $0x18] sm:$0xff]  ;;  %s3338_s23 = smov (!%p551_p10, %s2284_s23), 7 }
  0x20   : > { %v571_v10 = vld [vmem:[%s3322_s2 + $0x28] sm:$0xff]  ;;  %v931_v13 = vld [vmem:[%s3324_s5] sm:$0xff]  ;;  %v817_v14 = vld [vmem:[%s3323_s3 + $0x10] sm:$0xff]  ;;  %s3309_s26 = sshll.u32 %s3338_s23, 1 }
  0x21   : > { %v820_v12 = vld [vmem:[%s3323_s3 + $0x28] sm:$0xff]  ;;  %v933_v15 = vld [vmem:[%s3324_s5 + $0x10] sm:$0xff]  ;;  %v573_v17 = vld [vmem:[%s3322_s2 + $0x38] sm:$0xff]  ;;  %s554_s19 = scalar_lea.vmem %s3325_s18, %s3309_s26  ;;  %s542_s18 = scalar_lea.vmem [#allocation4], %s3091_s28 }
  0x22   : > { %700 = vperm.xlu0 %2481, %v570_v3   ;;  %688 = vperm.xlu1 %2479, %v567_v4   ;;  %v819_v18 = vld [vmem:[%s3323_s3 + $0x20] sm:$0xff]  ;;  %v821_v19 = vld [vmem:[%s3323_s3 + $0x30] sm:$0xff]  ;;  %v822_v20 = vld [vmem:[%s3323_s3 + $0x38] sm:$0xff]  ;;  %s3327_s3 = sshll.u32 %s3338_s23, 1  ;;  %s3187_s2 = scalar_lea.hbm %s3305_s15, %s3181_s20 }
  0x23   : > { %v932_v21 = vld [vmem:[%s3324_s5 + $0x8] sm:$0xff]  ;;  %v934_v22 = vld [vmem:[%s3324_s5 + $0x18] sm:$0xff]  ;;  %v565_v37 = vld [vmem:[%s554_s19] sm:$0xff]  ;;  %s3311_s19 = scalar_lea.vmem [#allocation6], %s3091_s28  ;;  %s560_s29 = scalar_lea.vmem %s3328_s1, %s3327_s3 }
  0x24   : > { %v722_v42 = vrot.slane %v565_v37, %v721_v31  ;;  %v730_v43 = vrot.slane %v565_v37, %v729_v32  ;;  %v622_v44 = vrot.slane %v565_v37, %v621_v33  ;;  %v630_v45 = vrot.slane %v565_v37, %v629_v34  ;;  %s2131_s30 = sshll.u32 %s542_s18, 4  ;;  %s2132_s30 = int_to_ptr.vmem [resolvable:$true] %s2131_s30 }
  0x25   : > { %v718_v46 = vrot.slane %v565_v37, %v2870_v35  ;;  %v726_v47 = vrot.slane %v565_v37, %v725_v36  ;;  %v618_v48 = vrot.slane %v565_v37, %v2876_v39  ;;  %v626_v49 = vrot.slane %v565_v37, %v625_v40  ;;  %s2503_s3 = scalar_lea.vmem %s2132_s30, 128 }
  0x26   : > { %708 = vperm.xlu0 %2481, %v572_v5   ;;  %2480 = vset.pattern.permute.xlu1 %v2628_v7  ;;  %v2884_v52 = vrot.slane %v722_v42, %v2870_v35  ;;  %v2887_v53 = vrot.slane %v730_v43, %v2870_v35  ;;  %v2890_v54 = vrot.slane %v622_v44, %v2876_v39  ;;  %p2504_p11 = scmp.ne.s32.totalorder %s2132_s30, %s2503_s3 }
  0x27   : > { %591 = vperm.xlu1 %2480, %v569_v6   ;;  %v2893_v55 = vrot.slane %v630_v45, %v2876_v39  ;;  %v2896_v56 = vrot.slane %v718_v46, %v2870_v35  ;;  %v2899_v57 = vrot.slane %v726_v47, %v2870_v35  ;;  %v2902_v58 = vrot.slane %v618_v48, %v2876_v39 }
  0x28   : > { %v2905_v59 = vrot.slane %v626_v49, %v2876_v39  ;;  %p2505_p12 = pnand %p2504_p11, %p2759_p5 }
  0x2a   : > { %2486 = vset.pattern.permute.xlu0 %v2628_v7  ;;  %p2506_p13 = pneg %p2505_p12 }
  0x2b   : > { %576 = vperm.xlu0 %2486, %v566_v1   ;;  %2482 = vset.pattern.permute.xlu1 %v2627_v2 }
  0x2c   : > { %696 = vperm.xlu1 %2482, %v569_v6  }
  0x2f   : > { %581 = vperm.xlu0 %2486, %v567_v4  }
  0x30   : > { %2483 = vset.pattern.permute.xlu1 %v2628_v7 }
  0x31   : > { %825 = vperm.xlu1 %2483, %v815_v8  }
  0x33   : > { %586 = vperm.xlu0 %2486, %v568_v0  }
  0x35   : > { %596 = vperm.xlu1 %2483, %v570_v3  }
  0x37   : > { %830 = vperm.xlu0 %2486, %v816_v9  }
  0x39   : > { %601 = vperm.xlu1 %2483, %v571_v10  }
  0x3b   : > { %840 = vperm.xlu0 %2486, %v818_v11  }
  0x3d   : > { %2484 = vset.pattern.permute.xlu1 %v2627_v2 }
  0x3e   : > { %704 = vperm.xlu1 %2484, %v571_v10  }
  0x3f   : > { %850 = vperm.xlu0 %2486, %v820_v12  }
  0x42   : > { %2485 = vset.pattern.permute.xlu1 %v2628_v7 }
  0x43   : > { %937 = vperm.xlu0 %2486, %v931_v13   ;;  %835 = vperm.xlu1 %2485, %v817_v14  }
  0x47   : > { %947 = vperm.xlu0 %2486, %v933_v15   ;;  %606 = vperm.xlu1 %2485, %v572_v5  }
  0x4b   : > { %1166 = vperm.xlu0 %2486, %v1163_v16   ;;  %611 = vperm.xlu1 %2485, %v573_v17  }
  0x4f   : > { %2487 = vset.pattern.permute.xlu1 %v2627_v2  ;;  %2490 = vset.pattern.permute.xlu0 %v2627_v2 }
  0x50   : > { %712 = vperm.xlu1 %2487, %v573_v17  }
  0x54   : > { %2488 = vset.pattern.permute.xlu1 %v2628_v7 }
  0x55   : > { %845 = vperm.xlu1 %2488, %v819_v18  }
  0x59   : > { %855 = vperm.xlu1 %2488, %v821_v19  }
  0x5d   : > { %860 = vperm.xlu1 %2488, %v822_v20  }
  0x61   : > { %942 = vperm.xlu1 %2488, %v932_v21  }
  0x65   : > { %952 = vperm.xlu1 %2488, %v934_v22  }
  0x69   : > { %1383 = vperm.xlu1 %2488, %v1377_v24  }
  0x6d   : > { %2489 = vset.pattern.permute.xlu1 %v2627_v2 }
  0x6e   : > { %1434 = vperm.xlu1 %2489, %v1377_v24  }
  0x72   : > { %2491 = vset.pattern.permute.xlu1 %v2628_v7 }
  0x9d   : > { %v685_v26 = vpop.permute.xlu1 %684  ;;  %v2853_v27 = vpop.permute.xlu0 %692 }
  0x9e   : > { %v752_v1 = vmul.f32 %v2884_v52, %v685_v26  ;;  %v754_v3 = vmul.f32 %v2887_v53, %v685_v26  ;;  %v751_v8 = vmul.f32 %v2896_v56, %v685_v26  ;;  %v753_v9 = vmul.f32 %v2899_v57, %v685_v26 }
  0x9f   : > { %v760_v44 = vmul.f32 %v2884_v52, %v2853_v27  ;;  %v761_v45 = vmul.f32 %v2899_v57, %v2853_v27  ;;  %v762_v46 = vmul.f32 %v2887_v53, %v2853_v27 }
  0xa1   : > { %v689_v29 = vpop.permute.xlu1 %688  ;;  %v2858_v30 = vpop.permute.xlu0 %700 }
  0xa2   : > { %v756_v12 = vmul.f32 %v2884_v52, %v689_v29  ;;  %v758_v13 = vmul.f32 %v2887_v53, %v689_v29  ;;  %v755_v17 = vmul.f32 %v2896_v56, %v689_v29  ;;  %v757_v18 = vmul.f32 %v2899_v57, %v689_v29 }
  0xa3   : > { %v759_v29 = vmul.f32 %v2896_v56, %v2853_v27 }
  0xa5   : > { %v2873_v38 = vpop.permute.xlu0 %708 }
  0xa6   : > { %v2879_v41 = vpop.permute.xlu1 %591 }
  0xaa   : > { %v577_v50 = vpop.permute.xlu0 %576 }
  0xab   : > { %v697_v51 = vpop.permute.xlu1 %696  ;;  %v652_v60 = vmul.f32 %v2890_v54, %v577_v50  ;;  %v654_v61 = vmul.f32 %v2893_v55, %v577_v50  ;;  %v651_v63 = vmul.f32 %v2902_v58, %v577_v50  ;;  %v653_v0 = vmul.f32 %v2905_v59, %v577_v50 }
  0xad   : > { %v784_v15 = vadd.f32 %v752_v1, %v652_v60  ;;  %v786_v16 = vadd.f32 %v754_v3, %v654_v61  ;;  %v783_v19 = vadd.f32 %v751_v8, %v651_v63  ;;  %v785_v20 = vadd.f32 %v753_v9, %v653_v0 }
  0xae   : > { %v582_v62 = vpop.permute.xlu0 %581  ;;  %v763_v1 = vmul.f32 %v2896_v56, %v697_v51  ;;  %v764_v3 = vmul.f32 %v2884_v52, %v697_v51 }
  0xaf   : > { %v656_v4 = vmul.f32 %v2890_v54, %v582_v62  ;;  %v658_v5 = vmul.f32 %v2893_v55, %v582_v62  ;;  %v655_v10 = vmul.f32 %v2902_v58, %v582_v62  ;;  %v657_v11 = vmul.f32 %v2905_v59, %v582_v62 }
  0xb0   : > { %v826_v6 = vpop.permute.xlu1 %825 }
  0xb1   : > { %v788_v22 = vadd.f32 %v756_v12, %v656_v4  ;;  %v864_v24 = vadd.f32 %v826_v6, %v784_v15  ;;  %v790_v25 = vadd.f32 %v758_v13, %v658_v5  ;;  %v866_v26 = vadd.f32 %v826_v6, %v786_v16 }
  0xb2   : > { %v587_v14 = vpop.permute.xlu0 %586  ;;  %v787_v31 = vadd.f32 %v755_v17, %v655_v10  ;;  %v863_v32 = vadd.f32 %v826_v6, %v783_v19  ;;  %v789_v33 = vadd.f32 %v757_v18, %v657_v11  ;;  %v865_v34 = vadd.f32 %v826_v6, %v785_v20 }
  0xb3   : > { %v896_v48 = vmax.f32 %v864_v24, 0.0  ;;  %v898_v49 = vmax.f32 %v866_v26, 0.0  ;;  %v765_v4 = vmul.f32 %v2899_v57, %v697_v51  ;;  %v766_v5 = vmul.f32 %v2887_v53, %v697_v51 }
  0xb4   : > { %v2923_v21 = vpop.permute.xlu1 %596  ;;  %v895_v50 = vmax.f32 %v863_v32, 0.0  ;;  %v897_v60 = vmax.f32 %v865_v34, 0.0  ;;  %v659_v10 = vmul.f32 %v2902_v58, %v587_v14  ;;  %v660_v11 = vmul.f32 %v2890_v54, %v587_v14 }
  0xb5   : > { %v661_v12 = vmul.f32 %v2905_v59, %v587_v14  ;;  %v662_v13 = vmul.f32 %v2893_v55, %v587_v14  ;;  %v663_v16 = vmul.f32 %v2902_v58, %v2879_v41  ;;  %v664_v17 = vmul.f32 %v2890_v54, %v2879_v41 }
  0xb6   : > { %v831_v36 = vpop.permute.xlu0 %830  ;;  %v665_v51 = vmul.f32 %v2905_v59, %v2879_v41  ;;  %v666_v18 = vmul.f32 %v2893_v55, %v2879_v41  ;;  %v792_v26 = vadd.f32 %v760_v44, %v660_v11 }
  0xb7   : > { %v868_v37 = vadd.f32 %v831_v36, %v788_v22  ;;  %v870_v40 = vadd.f32 %v831_v36, %v790_v25  ;;  %v867_v42 = vadd.f32 %v831_v36, %v787_v31  ;;  %v869_v43 = vadd.f32 %v831_v36, %v789_v33 }
  0xb8   : > { %v2933_v47 = vpop.permute.xlu1 %601  ;;  %v795_v20 = vadd.f32 %v763_v1, %v663_v16  ;;  %v796_v22 = vadd.f32 %v764_v3, %v664_v17  ;;  %v797_v14 = vadd.f32 %v765_v4, %v665_v51  ;;  %v798_v24 = vadd.f32 %v766_v5, %v666_v18 }
  0xb9   : > { %v900_v61 = vmax.f32 %v868_v37, 0.0  ;;  %v902_v62 = vmax.f32 %v870_v40, 0.0  ;;  %v899_v63 = vmax.f32 %v867_v42, 0.0  ;;  %v901_v0 = vmax.f32 %v869_v43, 0.0 }
  0xba   : > { %v841_v19 = vpop.permute.xlu0 %840  ;;  %v791_v25 = vadd.f32 %v759_v29, %v659_v10  ;;  %v793_v31 = vadd.f32 %v761_v45, %v661_v12  ;;  %v794_v32 = vadd.f32 %v762_v46, %v662_v13  ;;  %v673_v10 = vmul.f32 %v2905_v59, %v2933_v47 }
  0xbb   : > { %v2330_v6 = vpack.c.bf16 %v900_v61, %v896_v48  ;;  %v2346_v27 = vpack.c.bf16 %v902_v62, %v898_v49  ;;  %v2332_v8 = vpack.c.bf16 %v899_v63, %v895_v50  ;;  %v2348_v9 = vpack.c.bf16 %v901_v0, %v897_v60 }
  0xbc   : > { %v875_v33 = vadd.f32 %v841_v19, %v795_v20  ;;  %v876_v34 = vadd.f32 %v841_v19, %v796_v22  ;;  %v877_v36 = vadd.f32 %v841_v19, %v797_v14  ;;  %v878_v37 = vadd.f32 %v841_v19, %v798_v24 }
  0xbd   : > { %v705_v15 = vpop.permute.xlu1 %704  ;;  %2331 = vmatprep.subr.bf16.mxu0 %v2330_v6  ;;  %2347 = vmatprep.subr.bf16.mxu1 %v2346_v27  ;;  %v674_v11 = vmul.f32 %v2893_v55, %v2933_v47  ;;  %v767_v51 = vmul.f32 %v2896_v56, %v2858_v30  ;;  %v768_v18 = vmul.f32 %v2884_v52, %v2858_v30 }
  0xbe   : > { %2333 = vmatpush1.bf16.msra.mxu0 %v2332_v8  ;;  %2349 = vmatpush1.bf16.msra.mxu1 %v2348_v9  ;;  %v908_v63 = vmax.f32 %v876_v34, 0.0  ;;  %v910_v0 = vmax.f32 %v878_v37, 0.0  ;;  %v907_v29 = vmax.f32 %v875_v33, 0.0  ;;  %v909_v44 = vmax.f32 %v877_v36, 0.0 }
  0xbf   : > { %v771_v45 = vmul.f32 %v2896_v56, %v705_v15  ;;  %v772_v46 = vmul.f32 %v2884_v52, %v705_v15  ;;  %v773_v1 = vmul.f32 %v2899_v57, %v705_v15  ;;  %v774_v3 = vmul.f32 %v2887_v53, %v705_v15 }
  0xc0   : > { %v671_v8 = vmul.f32 %v2902_v58, %v2933_v47  ;;  %v672_v9 = vmul.f32 %v2890_v54, %v2933_v47  ;;  %v769_v19 = vmul.f32 %v2899_v57, %v2858_v30  ;;  %v770_v47 = vmul.f32 %v2887_v53, %v2858_v30 }
  0xc1   : > { %v805_v16 = vadd.f32 %v773_v1, %v673_v10  ;;  %v806_v17 = vadd.f32 %v774_v3, %v674_v11  ;;  %v667_v20 = vmul.f32 %v2902_v58, %v2923_v21  ;;  %v668_v22 = vmul.f32 %v2890_v54, %v2923_v21 }
  0xc2   : > { %v836_v40 = vpop.permute.xlu1 %835  ;;  %v803_v13 = vadd.f32 %v771_v45, %v671_v8  ;;  %v804_v15 = vadd.f32 %v772_v46, %v672_v9  ;;  %v669_v14 = vmul.f32 %v2905_v59, %v2923_v21  ;;  %v670_v24 = vmul.f32 %v2893_v55, %v2923_v21 }
  0xc3   : > { %v871_v42 = vadd.f32 %v836_v40, %v791_v25  ;;  %v872_v41 = vadd.f32 %v836_v40, %v792_v26  ;;  %v873_v43 = vadd.f32 %v836_v40, %v793_v31  ;;  %v874_v48 = vadd.f32 %v836_v40, %v794_v32  ;;  %v851_v25 = vpop.permute.xlu0 %850 }
  0xc4   : > { %v883_v26 = vadd.f32 %v851_v25, %v803_v13  ;;  %v884_v31 = vadd.f32 %v851_v25, %v804_v15  ;;  %v885_v32 = vadd.f32 %v851_v25, %v805_v16  ;;  %v886_v33 = vadd.f32 %v851_v25, %v806_v17 }
  0xc5   : > { %v904_v49 = vmax.f32 %v872_v41, 0.0  ;;  %v906_v50 = vmax.f32 %v874_v48, 0.0  ;;  %v903_v60 = vmax.f32 %v871_v42, 0.0  ;;  %v905_v61 = vmax.f32 %v873_v43, 0.0 }
  0xc6   : > { %v607_v62 = vpop.permute.xlu1 %606  ;;  %v775_v42 = vmul.f32 %v2896_v56, %v2873_v38  ;;  %v776_v21 = vmul.f32 %v2884_v52, %v2873_v38  ;;  %v777_v41 = vmul.f32 %v2899_v57, %v2873_v38  ;;  %v778_v43 = vmul.f32 %v2887_v53, %v2873_v38 }
  0xc7   : > { %v2334_v4 = vpack.c.bf16 %v908_v63, %v904_v49  ;;  %v2350_v5 = vpack.c.bf16 %v910_v0, %v906_v50  ;;  %v2336_v6 = vpack.c.bf16 %v907_v29, %v903_v60  ;;  %v2352_v27 = vpack.c.bf16 %v909_v44, %v905_v61 }
  0xc8   : > { %v675_v30 = vmul.f32 %v2902_v58, %v607_v62  ;;  %v676_v36 = vmul.f32 %v2890_v54, %v607_v62  ;;  %v677_v37 = vmul.f32 %v2905_v59, %v607_v62  ;;  %v678_v40 = vmul.f32 %v2893_v55, %v607_v62 }
  0xc9   : > { %2335 = vmatprep.subr.bf16.mxu0 %v2334_v4  ;;  %2351 = vmatprep.subr.bf16.mxu1 %v2350_v5  ;;  %v799_v48 = vadd.f32 %v767_v51, %v667_v20  ;;  %v800_v49 = vadd.f32 %v768_v18, %v668_v22  ;;  %v801_v50 = vadd.f32 %v769_v19, %v669_v14  ;;  %v916_v61 = vmax.f32 %v884_v31, 0.0 }
  0xca   : > { %v612_v12 = vpop.permute.xlu1 %611  ;;  %2337 = vmatpush1.bf16.msra.mxu0 %v2336_v6  ;;  %2353 = vmatpush1.bf16.msra.mxu1 %v2352_v27  ;;  %v802_v60 = vadd.f32 %v770_v47, %v670_v24  ;;  %v918_v63 = vmax.f32 %v886_v33, 0.0  ;;  %v915_v0 = vmax.f32 %v883_v26, 0.0  ;;  %v917_v62 = vmax.f32 %v885_v32, 0.0 }
  0xcb   : > { %v807_v44 = vadd.f32 %v775_v42, %v675_v30  ;;  %v808_v45 = vadd.f32 %v776_v21, %v676_v36  ;;  %v809_v46 = vadd.f32 %v777_v41, %v677_v37  ;;  %v810_v1 = vadd.f32 %v778_v43, %v678_v40 }
  0xcc   : > { %v679_v16 = vmul.f32 %v2902_v58, %v612_v12  ;;  %v680_v17 = vmul.f32 %v2890_v54, %v612_v12  ;;  %v681_v51 = vmul.f32 %v2905_v59, %v612_v12  ;;  %v682_v18 = vmul.f32 %v2893_v55, %v612_v12 }
  0xcf   : > { %v713_v34 = vpop.permute.xlu1 %712 }
  0xd0   : > { %v779_v27 = vmul.f32 %v2896_v56, %v713_v34  ;;  %v780_v38 = vmul.f32 %v2884_v52, %v713_v34  ;;  %v781_v8 = vmul.f32 %v2899_v57, %v713_v34  ;;  %v782_v9 = vmul.f32 %v2887_v53, %v713_v34 }
  0xd2   : > { %v811_v24 = vadd.f32 %v779_v27, %v679_v16  ;;  %v812_v25 = vadd.f32 %v780_v38, %v680_v17  ;;  %v813_v26 = vadd.f32 %v781_v8, %v681_v51  ;;  %v814_v31 = vadd.f32 %v782_v9, %v682_v18  ;;  %v1567_v27 = vld [vmem:[%s3301_s11 + $0x30] sm:$0xff]  ;;  %v1892_v38 = vld [vmem:[%s3303_s13] sm:$0x3] }
  0xd4   : > { %v846_v29 = vpop.permute.xlu1 %845 }
  0xd5   : > { %v879_v3 = vadd.f32 %v846_v29, %v799_v48  ;;  %v880_v4 = vadd.f32 %v846_v29, %v800_v49  ;;  %v881_v5 = vadd.f32 %v846_v29, %v801_v50  ;;  %v882_v6 = vadd.f32 %v846_v29, %v802_v60  ;;  %v927_v49 = vld [vmem:[%s3326_s4] sm:$0xff]  ;;  %v928_v50 = vld [vmem:[%s3326_s4 + $0x8] sm:$0xff]  ;;  %v929_v60 = vld [vmem:[%s3326_s4 + $0x10] sm:$0xff] }
  0xd6   : > { %v1497_v29 = vld [vmem:[%s3299_s9] sm:$0xff] }
  0xd7   : > { %v912_v10 = vmax.f32 %v880_v4, 0.0  ;;  %v914_v11 = vmax.f32 %v882_v6, 0.0  ;;  %v911_v13 = vmax.f32 %v879_v3, 0.0  ;;  %v913_v15 = vmax.f32 %v881_v5, 0.0  ;;  %v1563_v3 = vld [vmem:[%s3301_s11 + $0x10] sm:$0xff]  ;;  %v1566_v4 = vld [vmem:[%s3301_s11 + $0x28] sm:$0xff] }
  0xd8   : > { %v856_v19 = vpop.permute.xlu1 %855  ;;  %v1565_v5 = vld [vmem:[%s3301_s11 + $0x20] sm:$0xff]  ;;  %v1568_v6 = vld [vmem:[%s3301_s11 + $0x38] sm:$0xff] }
  0xd9   : > { %v887_v56 = vadd.f32 %v856_v19, %v807_v44  ;;  %v888_v47 = vadd.f32 %v856_v19, %v808_v45  ;;  %v889_v52 = vadd.f32 %v856_v19, %v809_v46  ;;  %v890_v20 = vadd.f32 %v856_v19, %v810_v1  ;;  %v1498_v44 = vld [vmem:[%s3299_s9 + $0x8] sm:$0xff]  ;;  %v1499_v45 = vld [vmem:[%s3299_s9 + $0x10] sm:$0xff]  ;;  %v1564_v1 = vld [vmem:[%s3301_s11 + $0x18] sm:$0xff] }
  0xda   : > { %v2338_v57 = vpack.c.bf16 %v916_v61, %v912_v10  ;;  %v2354_v22 = vpack.c.bf16 %v918_v63, %v914_v11  ;;  %v2340_v53 = vpack.c.bf16 %v915_v0, %v911_v13  ;;  %v2356_v14 = vpack.c.bf16 %v917_v62, %v913_v15  ;;  %v930_v61 = vld [vmem:[%s3326_s4 + $0x18] sm:$0xff]  ;;  %v1379_v63 = vld [vmem:[%s3298_s8 + $0x10] sm:$0xff]  ;;  %v1378_v0 = vld [vmem:[%s3298_s8 + $0x8] sm:$0xff]  ;;  %v938_v13 = vpop.permute.xlu0 %937  ;;  %s2097_s4 = sand.u32 1, %s2740_s25  }
  0xdb   : > { %v920_v12 = vmax.f32 %v888_v47, 0.0  ;;  %v922_v33 = vmax.f32 %v890_v20, 0.0  ;;  %v919_v34 = vmax.f32 %v887_v56, 0.0  ;;  %v921_v30 = vmax.f32 %v889_v52, 0.0  ;;  %1393 = vperm.xlu1 %2491, %v1379_v63   ;;  %1438 = vperm.xlu0 %2490, %v1378_v0   ;;  %v1380_v62 = vld [vmem:[%s3298_s8 + $0x18] sm:$0xff]  ;;  %v1562_v46 = vld [vmem:[%s3301_s11 + $0x8] sm:$0xff] }
  0xdc   : > { %2339 = vmatprep.subr.bf16.mxu0 %v2338_v57  ;;  %2355 = vmatprep.subr.bf16.mxu1 %v2354_v22  ;;  %v861_v54 = vpop.permute.xlu1 %860  ;;  %s3191_s26 = scalar_lea.sflag [#allocation5], %s2097_s4 }
  0xdd   : > { %v891_v58 = vadd.f32 %v861_v54, %v811_v24  ;;  %v892_v59 = vadd.f32 %v861_v54, %v812_v25  ;;  %v893_v32 = vadd.f32 %v861_v54, %v813_v26  ;;  %v894_v55 = vadd.f32 %v861_v54, %v814_v31  ;;  %2341 = vmatpush1.bf16.msra.mxu0 %v2340_v53 }
  0xde   : > { %2357 = vmatpush1.bf16.msra.mxu1 %v2356_v14 }
  0xdf   : > { %v924_v36 = vmax.f32 %v892_v59, 0.0  ;;  %v926_v37 = vmax.f32 %v894_v55, 0.0  ;;  %v923_v40 = vmax.f32 %v891_v58, 0.0  ;;  %v925_v42 = vmax.f32 %v893_v32, 0.0  ;;  %1398 = vperm.xlu1 %2491, %v1380_v62   ;;  %1442 = vperm.xlu0 %2490, %v1379_v63  }
  0xe0   : > { %v943_v15 = vpop.permute.xlu1 %942 }
  0xe1   : > { %v2342_v21 = vpack.c.bf16 %v924_v36, %v920_v12  ;;  %v2358_v41 = vpack.c.bf16 %v926_v37, %v922_v33  ;;  %v2344_v43 = vpack.c.bf16 %v923_v40, %v919_v34  ;;  %v2360_v48 = vpack.c.bf16 %v925_v42, %v921_v30  ;;  %v948_v36 = vpop.permute.xlu0 %947 }
  0xe3   : > { %2343 = vmatprep.subr.bf16.mxu0 %v2342_v21  ;;  %2359 = vmatprep.subr.bf16.mxu1 %v2358_v41 }
  0xe4   : > { %2345 = vmatpush1.bf16.msra.mxu0 %v2344_v43  ;;  %2361 = vmatpush1.bf16.msra.mxu1 %v2360_v48  ;;  %v953_v42 = vpop.permute.xlu1 %952 }
  0xe5   : > { %2493 = vset.pattern.permute.xlu1 %v2627_v2  ;;  %2492 = vset.pattern.permute.xlu0 %v2628_v7  ;;  %v1500_v2 = vld [vmem:[%s3299_s9 + $0x18] sm:$0xff] }
  0xe6   : > { %1446 = vperm.xlu1 %2493, %v1380_v62   ;;  %1388 = vperm.xlu0 %2492, %v1378_v0  }
  0xe7   : > { %2288 = vmatmul.mubr.msk.f32.vlgmr.msra.gmra.mrb[0].mxu0 %vm955_vm0, %v927_v49  ;;  %2292 = vmatmul.mubr.msk.f32.vlgmr.msra.gmra.mrb[0].mxu1 %vm955_vm0, %v927_v49 }
  0xe8   : > { %1038 = vmatprep.mubr.f32.mxu0 %v2629_v23  ;;  %1127 = vmatprep.mubr.f32.mxu1 %v2629_v23 }
  0xea   : > { %2494 = vset.pattern.permute.xlu1 %v2628_v7  ;;  %1503 = vperm.xlu0 %2492, %v1497_v29   ;;  %v1561_v7 = vld [vmem:[%s3301_s11] sm:$0xff] }
  0xeb   : > { %2289 = vmatmul.mubr.msk.f32.gmra.mrb[2].mxu0 %vm955_vm0, %v928_v50  ;;  %2293 = vmatmul.mubr.msk.f32.gmra.mrb[2].mxu1 %vm955_vm0, %v928_v50 }
  0xec   : > { %1044 = vmatprep.mubr.f32.mxu0 %v2629_v23  ;;  %1133 = vmatprep.mubr.f32.mxu1 %v2629_v23 }
  0xed   : > { %1508 = vperm.xlu1 %2494, %v1498_v44  }
  0xee   : > { %1518 = vperm.xlu0 %2492, %v1500_v2  }
  0xef   : > { %2290 = vmatmul.mubr.msk.f32.gmra.mrb[4].mxu0 %vm955_vm0, %v929_v60  ;;  %2294 = vmatmul.mubr.msk.f32.gmra.mrb[4].mxu1 %vm955_vm0, %v929_v60 }
  0xf0   : > { %1050 = vmatprep.mubr.f32.mxu0 %v2629_v23  ;;  %1139 = vmatprep.mubr.f32.mxu1 %v2629_v23 }
  0xf1   : > { %1513 = vperm.xlu1 %2494, %v1499_v45  }
  0xf2   : > { %1576 = vperm.xlu0 %2492, %v1562_v46  }
  0xf3   : > { %2291 = vmatmul.mubr.msk.f32.gmra.mrb[6].mxu0 %vm955_vm0, %v930_v61  ;;  %2295 = vmatmul.mubr.msk.f32.gmra.mrb[6].mxu1 %vm955_vm0, %v930_v61 }
  0xf4   : > { %1237 = vmatprep.mubr.f32.mxu0 %v2629_v23  ;;  %1308 = vmatprep.mubr.f32.mxu1 %v2629_v23 }
  0xf5   : > { %1571 = vperm.xlu1 %2494, %v1561_v7  }
  0xf6   : > { %1586 = vperm.xlu0 %2492, %v1564_v1  }
  0xf9   : > { %1581 = vperm.xlu1 %2494, %v1563_v3  }
  0xfa   : > { %1596 = vperm.xlu0 %2492, %v1566_v4  }
  0xfd   : > { %1591 = vperm.xlu1 %2494, %v1565_v5  }
  0xfe   : > { %1606 = vperm.xlu0 %2492, %v1568_v6  }
 0x101   : > { %1601 = vperm.xlu1 %2494, %v1567_v27  }
 0x105   : > { %1895 = vperm.xlu1 %2494, %v1892_v38  }
 0x1ba   : > { %v1034_v8 = vpop.f32.mrb[0].mxu0  ;;  %v1123_v9 = vpop.f32.mrb[0].mxu1 }
 0x1bb   : > { %v1036_v10 = vpop.f32.mrb[1].mxu0  ;;  %v1125_v11 = vpop.f32.mrb[1].mxu1  ;;  %v1035_v16 = vadd.f32 %v1034_v8, %v938_v13  ;;  %v1124_v17 = vadd.f32 %v1123_v9, %v938_v13  ;;  %v1162_v8 = vld [vmem:[%s3296_s6] sm:$0xf]  ;;  %v2630_v9 = vmov 1983009808  }
 0x1bc   : > { %v1037_v51 = vadd.f32 %v1036_v10, %v938_v13  ;;  %v1126_v18 = vadd.f32 %v1125_v11, %v938_v13  ;;  %v1335_v10 = vunpack.c.l.s4 %v2630_v9  ;;  %v1167_v13 = vpop.permute.xlu0 %1166 }
 0x1bd   : > { %v1146_v14 = vmax.f32 %v1035_v16, 0.0  ;;  %v1148_v24 = vmax.f32 %v1124_v17, 0.0 }
 0x1be   : > { %v1040_v19 = vpop.f32.mrb[2].mxu0  ;;  %v1129_v56 = vpop.f32.mrb[2].mxu1  ;;  %v1147_v31 = vmax.f32 %v1037_v51, 0.0  ;;  %v1149_v54 = vmax.f32 %v1126_v18, 0.0  ;;  %v1336_v11 = vunpack.c.0.s8 %v1335_v10 }
 0x1bf   : > { %v1041_v47 = vadd.f32 %v1040_v19, %v943_v15  ;;  %v1130_v52 = vadd.f32 %v1129_v56, %v943_v15  ;;  %v1042_v20 = vpop.f32.mrb[3].mxu0  ;;  %v1131_v57 = vpop.f32.mrb[3].mxu1 }
 0x1c0   : > { %v1043_v22 = vadd.f32 %v1042_v20, %v943_v15  ;;  %v1132_v53 = vadd.f32 %v1131_v57, %v943_v15 }
 0x1c1   : > { %v1150_v25 = vmax.f32 %v1041_v47, 0.0  ;;  %v1152_v26 = vmax.f32 %v1130_v52, 0.0  ;;  %v3087_v47 = vsub.s32 %v1336_v11, %v2856_v28 }
 0x1c2   : > { %v1151_v58 = vmax.f32 %v1043_v22, 0.0  ;;  %v1153_v59 = vmax.f32 %v1132_v53, 0.0  ;;  %v1046_v32 = vpop.f32.mrb[4].mxu0  ;;  %v1135_v55 = vpop.f32.mrb[4].mxu1 }
 0x1c3   : > { %v2364_v12 = vpack.c.bf16 %v1150_v25, %v1146_v14  ;;  %v2372_v33 = vpack.c.bf16 %v1152_v26, %v1148_v24  ;;  %v1048_v34 = vpop.f32.mrb[5].mxu0  ;;  %v1137_v30 = vpop.f32.mrb[5].mxu1  ;;  %v1047_v21 = vadd.f32 %v1046_v32, %v948_v36  ;;  %v1136_v41 = vadd.f32 %v1135_v55, %v948_v36 }
 0x1c4   : > { %v2362_v37 = vpack.c.bf16 %v1151_v58, %v1147_v31  ;;  %v2370_v40 = vpack.c.bf16 %v1153_v59, %v1149_v54  ;;  %v1049_v43 = vadd.f32 %v1048_v34, %v948_v36  ;;  %v1138_v48 = vadd.f32 %v1137_v30, %v948_v36 }
 0x1c5   : > { %v1154_v44 = vmax.f32 %v1047_v21, 0.0  ;;  %v1156_v2 = vmax.f32 %v1136_v41, 0.0  ;;  %v1315_v41 = vld [vmem:[%s560_s29] sm:$0xff] }
 0x1c6   : > { %v1052_v49 = vpop.f32.mrb[6].mxu0  ;;  %v1141_v50 = vpop.f32.mrb[6].mxu1  ;;  %2363 = vmatprep.subr.bf16.mxu0 %v2362_v37  ;;  %2371 = vmatprep.subr.bf16.mxu1 %v2370_v40  ;;  %v1155_v7 = vmax.f32 %v1049_v43, 0.0  ;;  %v1157_v1 = vmax.f32 %v1138_v48, 0.0 }
 0x1c7   : > { %v1053_v60 = vadd.f32 %v1052_v49, %v953_v42  ;;  %v1142_v61 = vadd.f32 %v1141_v50, %v953_v42  ;;  %v1054_v63 = vpop.f32.mrb[7].mxu0  ;;  %v1143_v0 = vpop.f32.mrb[7].mxu1  ;;  %2365 = vmatpush1.bf16.msra.mxu0 %v2364_v12  ;;  %2373 = vmatpush1.bf16.msra.mxu1 %v2372_v33 }
 0x1c8   : > { %v1055_v62 = vadd.f32 %v1054_v63, %v953_v42  ;;  %v1144_v29 = vadd.f32 %v1143_v0, %v953_v42  ;;  %v1384_v33 = vpop.permute.xlu1 %1383  ;;  %v1439_v48 = vpop.permute.xlu0 %1438 }
 0x1c9   : > { %v1158_v45 = vmax.f32 %v1053_v60, 0.0  ;;  %v1160_v46 = vmax.f32 %v1142_v61, 0.0 }
 0x1ca   : > { %v1159_v3 = vmax.f32 %v1055_v62, 0.0  ;;  %v1161_v4 = vmax.f32 %v1144_v29, 0.0 }
 0x1cb   : > { %v2368_v5 = vpack.c.bf16 %v1158_v45, %v1154_v44  ;;  %v2376_v6 = vpack.c.bf16 %v1160_v46, %v1156_v2 }
 0x1cc   : > { %v2366_v27 = vpack.c.bf16 %v1159_v3, %v1155_v7  ;;  %v2374_v38 = vpack.c.bf16 %v1161_v4, %v1157_v1  ;;  %v1435_v40 = vpop.permute.xlu1 %1434  ;;  %v1443_v29 = vpop.permute.xlu0 %1442 }
 0x1ce   : > { %2367 = vmatprep.subr.bf16.mxu0 %v2366_v27  ;;  %2375 = vmatprep.subr.bf16.mxu1 %v2374_v38 }
 0x1cf   : > { %2369 = vmatpush1.bf16.msra.mxu0 %v2368_v5  ;;  %2377 = vmatpush1.bf16.msra.mxu1 %v2376_v6 }
 0x1d0   : > { %v1394_v50 = vpop.permute.xlu1 %1393 }
 0x1d2   : > { %2296 = vmatmul.mubr.msk.f32.vlgmr.msra.gmra.mrb[8].mxu0 %vm1169_vm1, %v1162_v8  ;;  %2297 = vmatmul.mubr.msk.f32.vlgmr.msra.gmra.mrb[8].mxu1 %vm1169_vm1, %v1162_v8 }
 0x1d3   : > { %1697 = vmatprep.mubr.f32.mxu0 %v2629_v23  ;;  %1810 = vmatprep.mubr.f32.mxu1 %v2629_v23 }
 0x1d4   : > { %v1399_v1 = vpop.permute.xlu1 %1398 }
 0x2a5   : > { %v1239_v15 = vpop.f32.mrb[8].mxu0  ;;  %v1310_v16 = vpop.f32.mrb[8].mxu1 }
 0x2a6   : > { %v1240_v17 = vadd.f32 %v1239_v15, %v1167_v13  ;;  %v1311_v51 = vadd.f32 %v1310_v16, %v1167_v13  ;;  %v1241_v18 = vpop.f32.mrb[9].mxu0  ;;  %v1312_v19 = vpop.f32.mrb[9].mxu1 }
 0x2a7   : > { %v1242_v56 = vadd.f32 %v1241_v18, %v1167_v13  ;;  %v1313_v52 = vadd.f32 %v1312_v19, %v1167_v13  ;;  %v1389_v15 = vpop.permute.xlu0 %1388 }
 0x2a8   : > { %v1316_v20 = vmul.f32 0.5, %v1240_v17  ;;  %v1318_v57 = vmul.f32 0.5, %v1311_v51 }
 0x2a9   : > { %v1317_v22 = vmul.f32 0.5, %v1242_v56  ;;  %v2070_v53 = vcombine.low %v1240_v17, %v1242_v56  ;;  %v1319_v14 = vmul.f32 0.5, %v1313_v52  ;;  %v2071_v24 = vcombine.low %v1311_v51, %v1313_v52 }
 0x2aa   : > { %v1320_v25 = vmul.f32 1.442695, %v1316_v20  ;;  %v1324_v26 = vmul.f32 1.442695, %v1318_v57  ;;  %v1447_v57 = vpop.permute.xlu1 %1446 }
 0x2ab   : > { %v1322_v31 = vmul.f32 1.442695, %v1317_v22  ;;  %v2078_v28 = vrot.slane %v2070_v53, %v3087_v47  ;;  %v1326_v54 = vmul.f32 1.442695, %v1319_v14  ;;  %v2085_v58 = vrot.slane %v2071_v24, %v3087_v47 }
 0x2ac   : > { %2495 = vpow2.f32 %v1320_v25 }
 0x2ad   : > { %2497 = vpow2.f32 %v1324_v26  ;;  %v2086_v59 = vcombine.low %v2078_v28, %v2085_v58  ;;  %v2089_v32 = vcombine.high %v2078_v28, %v2085_v58 }
 0x2ae   : > { %2499 = vpow2.f32 %v1322_v31 }
 0x2af   : > { %2501 = vpow2.f32 %v1326_v54  ;;  %2088 = vst [vmem:[%s542_s18] sm:$0xff] %v2086_v59  ;;  %2091 = vst [vmem:[%s3311_s19] sm:$0xff] %v2089_v32  ;;  %v1504_v59 = vpop.permute.xlu0 %1503  ;;  %s2631_s19 = smov [#allocation4]  }
 0x2b0   : > { %s2507_s1 = sshll.u32 %s2631_s19, 4  ;;  %s2508_s1 = int_to_ptr.vmem [resolvable:$false] %s2507_s1 }
 0x2b1   : > { %s2509_s25 = scalar_lea.vmem %s2508_s1, 256  ;;  %p2510_p0 = scmp.lt.s32.totalorder %s2132_s30, %s2508_s1 }
 0x2b2   : > { %p2511_p1 = scmp.lt.s32.totalorder %s2509_s25, %s2503_s3 }
 0x2b4   : > { %p2512_p2 = por %p2511_p1, %p2510_p0 }
 0x2b6   : > { %v2496_v55 = vpop.eup %2495  ;;  %p2513_p3 = pnand %p2512_p2, %p2506_p13 }
 0x2b7   : > { %v2498_v12 = vpop.eup %2497 }
 0x2b8   : > { %v2500_v34 = vpop.eup %2499 }
 0x2b9   : > { %v2502_v30 = vpop.eup %2501  ;;  %v1332_v36 = vcombine.low %v2496_v55, %v2500_v34 }
 0x2ba   : > { %v1333_v37 = vcombine.low %v2498_v12, %v2502_v30 }
 0x2bb   : > { %v1340_v42 = vrot.slane %v1332_v36, %v3087_v47 }
 0x2bc   : > { %v1347_v21 = vrot.slane %v1333_v37, %v3087_v47 }
 0x2be   : > { %v1348_v43 = vcombine.high %v1340_v42, %v1347_v21 }
 0x2c0   : > { %v1350_v49 = vmul.f32 %v1348_v43, %v1315_v41 }
 0x2c2   : > { %v1352_v60 = vcombine.high %v1350_v49, %v1350_v49  ;;  %v1359_v61 = vrot.slane %v1350_v49, %v3087_v47  ;;  %v1509_v49 = vpop.permute.xlu1 %1508 }
 0x2c4   : > { %v1366_v63 = vrot.slane %v1352_v60, %v3087_v47  ;;  %v1367_v0 = vcombine.high %v1359_v61, %v1359_v61  ;;  %v1373_v62 = vadd.f32 %v1359_v61, %v1240_v17 }
 0x2c6   : > { %v1368_v44 = vcombine.high %v1366_v63, %v1366_v63  ;;  %v1375_v2 = vadd.f32 %v1366_v63, %v1311_v51  ;;  %v1374_v45 = vadd.f32 %v1367_v0, %v1242_v56  ;;  %v1452_v46 = vrot.slane %v1373_v62, %v2870_v35 }
 0x2c7   : > { %v1404_v7 = vrot.slane %v1373_v62, %v2876_v39 }
 0x2c8   : > { %v1376_v3 = vadd.f32 %v1368_v44, %v1313_v52  ;;  %v1412_v4 = vrot.slane %v1375_v2, %v2876_v39  ;;  %v1460_v5 = vrot.slane %v1375_v2, %v2870_v35  ;;  %v1456_v6 = vrot.slane %v1374_v45, %v2870_v35 }
 0x2c9   : > { %v1408_v27 = vrot.slane %v1374_v45, %v2876_v39  ;;  %v1469_v9 = vmul.f32 %v1452_v46, %v1439_v48  ;;  %v1425_v11 = vmul.f32 %v1404_v7, %v1394_v50  ;;  %v1473_v13 = vmul.f32 %v1452_v46, %v1443_v29 }
 0x2ca   : > { %v1416_v38 = vrot.slane %v1376_v3, %v2876_v39  ;;  %v1464_v8 = vrot.slane %v1376_v3, %v2870_v35  ;;  %v1470_v10 = vmul.f32 %v1456_v6, %v1439_v48  ;;  %v1471_v16 = vmul.f32 %v1460_v5, %v1439_v48 }
 0x2cb   : > { %v1426_v17 = vmul.f32 %v1408_v27, %v1394_v50  ;;  %v1427_v51 = vmul.f32 %v1412_v4, %v1394_v50  ;;  %v1474_v18 = vmul.f32 %v1456_v6, %v1443_v29  ;;  %v1475_v56 = vmul.f32 %v1460_v5, %v1443_v29 }
 0x2cc   : > { %v1472_v19 = vmul.f32 %v1464_v8, %v1439_v48  ;;  %v1429_v52 = vmul.f32 %v1404_v7, %v1399_v1  ;;  %v1421_v20 = vmul.f32 %v1404_v7, %v1389_v15  ;;  %v1430_v22 = vmul.f32 %v1408_v27, %v1399_v1 }
 0x2cd   : > { %v1422_v53 = vmul.f32 %v1408_v27, %v1389_v15  ;;  %v1423_v14 = vmul.f32 %v1412_v4, %v1389_v15  ;;  %v1424_v39 = vmul.f32 %v1416_v38, %v1389_v15  ;;  %v1432_v24 = vmul.f32 %v1416_v38, %v1399_v1 }
 0x2ce   : > { %v1477_v35 = vmul.f32 %v1452_v46, %v1447_v57  ;;  %v1478_v25 = vmul.f32 %v1456_v6, %v1447_v57  ;;  %v1417_v26 = vmul.f32 %v1404_v7, %v1384_v33  ;;  %v1418_v31 = vmul.f32 %v1408_v27, %v1384_v33  ;;  %v1519_v27 = vpop.permute.xlu0 %1518 }
 0x2cf   : > { %v1419_v28 = vmul.f32 %v1412_v4, %v1384_v33  ;;  %v1420_v54 = vmul.f32 %v1416_v38, %v1384_v33  ;;  %v1465_v58 = vmul.f32 %v1452_v46, %v1435_v40  ;;  %v1466_v32 = vmul.f32 %v1456_v6, %v1435_v40 }
 0x2d0   : > { %v1467_v55 = vmul.f32 %v1460_v5, %v1435_v40  ;;  %v1468_v12 = vmul.f32 %v1464_v8, %v1435_v40  ;;  %v1485_v34 = vadd.f32 %v1469_v9, %v1421_v20  ;;  %v1486_v36 = vadd.f32 %v1470_v10, %v1422_v53 }
 0x2d1   : > { %v1481_v30 = vadd.f32 %v1465_v58, %v1417_v26  ;;  %v1487_v37 = vadd.f32 %v1471_v16, %v1423_v14  ;;  %v1488_v42 = vadd.f32 %v1472_v19, %v1424_v39  ;;  %v1480_v21 = vmul.f32 %v1464_v8, %v1447_v57 }
 0x2d2   : > { %v1482_v41 = vadd.f32 %v1466_v32, %v1418_v31  ;;  %v1483_v43 = vadd.f32 %v1467_v55, %v1419_v28  ;;  %v1484_v48 = vadd.f32 %v1468_v12, %v1420_v54  ;;  %v1428_v60 = vmul.f32 %v1416_v38, %v1394_v50 }
 0x2d3   : > { %v1476_v61 = vmul.f32 %v1464_v8, %v1443_v29  ;;  %v1431_v63 = vmul.f32 %v1412_v4, %v1399_v1  ;;  %v1479_v0 = vmul.f32 %v1460_v5, %v1447_v57  ;;  %v1521_v33 = vadd.f32 %v1504_v59, %v1481_v30  ;;  %v1514_v5 = vpop.permute.xlu1 %1513 }
 0x2d4   : > { %v1525_v62 = vadd.f32 %v1509_v49, %v1485_v34  ;;  %v1526_v44 = vadd.f32 %v1509_v49, %v1486_v36  ;;  %v1527_v2 = vadd.f32 %v1509_v49, %v1487_v37  ;;  %v1522_v45 = vadd.f32 %v1504_v59, %v1482_v41  ;;  %v1553_v36 = vld [vmem:[%s3300_s10] sm:$0xff]  ;;  %v1554_v37 = vld [vmem:[%s3300_s10 + $0x8] sm:$0xff] }
 0x2d5   : > { %v1528_v40 = vadd.f32 %v1509_v49, %v1488_v42  ;;  %v1493_v46 = vadd.f32 %v1477_v35, %v1429_v52  ;;  %v1494_v7 = vadd.f32 %v1478_v25, %v1430_v22  ;;  %v1523_v3 = vadd.f32 %v1504_v59, %v1483_v43  ;;  %v1555_v42 = vld [vmem:[%s3300_s10 + $0x10] sm:$0xff]  ;;  %v1557_v41 = vld [vmem:[%s3300_s10 + $0x20] sm:$0xff]  ;;  %v1558_v43 = vld [vmem:[%s3300_s10 + $0x28] sm:$0xff] }
 0x2d6   : > { %v1524_v6 = vadd.f32 %v1504_v59, %v1484_v48  ;;  %v1496_v9 = vadd.f32 %v1480_v21, %v1432_v24  ;;  %v1489_v10 = vadd.f32 %v1473_v13, %v1425_v11  ;;  %v1495_v15 = vadd.f32 %v1479_v0, %v1431_v63  ;;  %v1556_v21 = vld [vmem:[%s3300_s10 + $0x18] sm:$0xff]  ;;  %v1559_v48 = vld [vmem:[%s3300_s10 + $0x30] sm:$0xff] }
 0x2d7   : > { %v1534_v16 = vadd.f32 %v1519_v27, %v1494_v7  ;;  %v1490_v19 = vadd.f32 %v1474_v18, %v1426_v17  ;;  %v1491_v50 = vadd.f32 %v1475_v56, %v1427_v51  ;;  %v1537_v29 = vmax.f32 %v1521_v33, 0.0  ;;  %v1560_v49 = vld [vmem:[%s3300_s10 + $0x38] sm:$0xff]  ;;  %v1572_v63 = vpop.permute.xlu1 %1571 }
 0x2d8   : > { %v1541_v1 = vmax.f32 %v1525_v62, 0.0  ;;  %v1533_v4 = vadd.f32 %v1519_v27, %v1493_v46  ;;  %v1492_v38 = vadd.f32 %v1476_v61, %v1428_v60  ;;  %v1536_v8 = vadd.f32 %v1519_v27, %v1496_v9 }
 0x2d9   : > { %v1529_v20 = vadd.f32 %v1514_v5, %v1489_v10  ;;  %v1530_v57 = vadd.f32 %v1514_v5, %v1490_v19  ;;  %v1538_v53 = vmax.f32 %v1522_v45, 0.0  ;;  %v1539_v52 = vmax.f32 %v1523_v3, 0.0 }
 0x2da   : > { %v1543_v22 = vmax.f32 %v1527_v2, 0.0  ;;  %v1532_v14 = vadd.f32 %v1514_v5, %v1492_v38  ;;  %v1542_v39 = vmax.f32 %v1526_v44, 0.0  ;;  %v1535_v35 = vadd.f32 %v1519_v27, %v1495_v15  ;;  %v1577_v44 = vpop.permute.xlu0 %1576 }
 0x2db   : > { %v1531_v24 = vadd.f32 %v1514_v5, %v1491_v50  ;;  %v1546_v11 = vmax.f32 %v1530_v57, 0.0  ;;  %v1550_v13 = vmax.f32 %v1534_v16, 0.0  ;;  %v1549_v25 = vmax.f32 %v1533_v4, 0.0 }
 0x2dc   : > { %v2378_v17 = vpack.c.bf16 %v1542_v39, %v1538_v53  ;;  %v1540_v51 = vmax.f32 %v1524_v6, 0.0  ;;  %v1544_v18 = vmax.f32 %v1528_v40, 0.0  ;;  %v1545_v56 = vmax.f32 %v1529_v20, 0.0 }
 0x2dd   : > { %v2380_v26 = vpack.c.bf16 %v1541_v1, %v1537_v29  ;;  %v1548_v31 = vmax.f32 %v1532_v14, 0.0  ;;  %v1552_v28 = vmax.f32 %v1536_v8, 0.0  ;;  %v2382_v54 = vpack.c.bf16 %v1550_v13, %v1546_v11  ;;  %v1582_v8 = vpop.permute.xlu1 %1581 }
 0x2de   : > { %2379 = vmatprep.subr.bf16.mxu0 %v2378_v17  ;;  %v2386_v58 = vpack.c.bf16 %v1544_v18, %v1540_v51  ;;  %v1551_v59 = vmax.f32 %v1535_v35, 0.0  ;;  %v1547_v32 = vmax.f32 %v1531_v24, 0.0  ;;  %v2388_v55 = vpack.c.bf16 %v1543_v22, %v1539_v52  ;;  %v1587_v35 = vpop.permute.xlu0 %1586 }
 0x2df   : > { %2381 = vmatpush1.bf16.msra.mxu0 %v2380_v26  ;;  %v2390_v12 = vpack.c.bf16 %v1552_v28, %v1548_v31  ;;  %v2384_v34 = vpack.c.bf16 %v1549_v25, %v1545_v56 }
 0x2e0   : > { %2383 = vmatprep.subr.bf16.mxu0 %v2382_v54  ;;  %2387 = vmatprep.subr.bf16.mxu1 %v2386_v58  ;;  %v2392_v30 = vpack.c.bf16 %v1551_v59, %v1547_v32 }
 0x2e1   : > { %2389 = vmatpush1.bf16.msra.mxu1 %v2388_v55 }
 0x2e2   : > { %2391 = vmatprep.subr.bf16.mxu1 %v2390_v12 }
 0x2e3   : > { %2385 = vmatpush1.bf16.msra.mxu0 %v2384_v34 }
 0x2e5   : > { %2393 = vmatpush1.bf16.msra.mxu1 %v2392_v30 }
 0x2e6   : > { %2298 = vmatmul.mubr.msk.f32.vlgmr.msra.gmra.mrb[10].mxu0 %vm1169_vm1, %v1553_v36 }
 0x2e7   : > { %1703 = vmatprep.mubr.f32.mxu0 %v2629_v23 }
 0x2e8   : > { %2306 = vmatmul.mubr.msk.f32.vlgmr.msra.gmra.mrb[10].mxu1 %vm1169_vm1, %v1553_v36 }
 0x2e9   : > { %1816 = vmatprep.mubr.f32.mxu1 %v2629_v23 }
 0x2ea   : > { %2299 = vmatmul.mubr.msk.f32.gmra.mrb[12].mxu0 %vm1169_vm1, %v1554_v37 }
 0x2eb   : > { %1709 = vmatprep.mubr.f32.mxu0 %v2629_v23 }
 0x2ec   : > { %2307 = vmatmul.mubr.msk.f32.gmra.mrb[12].mxu1 %vm1169_vm1, %v1554_v37 }
 0x2ed   : > { %1822 = vmatprep.mubr.f32.mxu1 %v2629_v23 }
 0x2ee   : > { %2300 = vmatmul.mubr.msk.f32.gmra.mrb[14].mxu0 %vm1169_vm1, %v1555_v42 }
 0x2ef   : > { %1715 = vmatprep.mubr.f32.mxu0 %v2629_v23 }
 0x2f0   : > { %2308 = vmatmul.mubr.msk.f32.gmra.mrb[14].mxu1 %vm1169_vm1, %v1555_v42  ;;  %v1592_v42 = vpop.permute.xlu1 %1591 }
 0x2f1   : > { %1828 = vmatprep.mubr.f32.mxu1 %v2629_v23 }
 0x2f2   : > { %2301 = vmatmul.mubr.msk.f32.gmra.mrb[16].mxu0 %vm1169_vm1, %v1556_v21 }
 0x2f3   : > { %1721 = vmatprep.mubr.f32.mxu0 %v2629_v23 }
 0x2f4   : > { %2309 = vmatmul.mubr.msk.f32.gmra.mrb[16].mxu1 %vm1169_vm1, %v1556_v21 }
 0x2f5   : > { %1834 = vmatprep.mubr.f32.mxu1 %v2629_v23 }
 0x2f6   : > { %2302 = vmatmul.mubr.msk.f32.gmra.mrb[18].mxu0 %vm1169_vm1, %v1557_v41 }
 0x2f7   : > { %1727 = vmatprep.mubr.f32.mxu0 %v2629_v23 }
 0x2f8   : > { %2310 = vmatmul.mubr.msk.f32.gmra.mrb[18].mxu1 %vm1169_vm1, %v1557_v41 }
 0x2f9   : > { %1840 = vmatprep.mubr.f32.mxu1 %v2629_v23 }
 0x2fa   : > { %2303 = vmatmul.mubr.msk.f32.gmra.mrb[20].mxu0 %vm1169_vm1, %v1558_v43 }
 0x2fb   : > { %1733 = vmatprep.mubr.f32.mxu0 %v2629_v23 }
 0x2fc   : > { %2311 = vmatmul.mubr.msk.f32.gmra.mrb[20].mxu1 %vm1169_vm1, %v1558_v43 }
 0x2fd   : > { %1846 = vmatprep.mubr.f32.mxu1 %v2629_v23 }
 0x2fe   : > { %2304 = vmatmul.mubr.msk.f32.gmra.mrb[22].mxu0 %vm1169_vm1, %v1559_v48 }
 0x2ff   : > { %1739 = vmatprep.mubr.f32.mxu0 %v2629_v23 }
 0x300   : > { %2312 = vmatmul.mubr.msk.f32.gmra.mrb[22].mxu1 %vm1169_vm1, %v1559_v48 }
 0x301   : > { %1852 = vmatprep.mubr.f32.mxu1 %v2629_v23 }
 0x302   : > { %2305 = vmatmul.mubr.msk.f32.gmra.mrb[24].mxu0 %vm1169_vm1, %v1560_v49 }
 0x303   : > { %1965 = vmatprep.mubr.f32.mxu0 %v2629_v23 }
 0x304   : > { %2313 = vmatmul.mubr.msk.f32.gmra.mrb[24].mxu1 %vm1169_vm1, %v1560_v49 }
 0x305   : > { %2036 = vmatprep.mubr.f32.mxu1 %v2629_v23 }
 0x3b9   : > { %v1699_v60 = vpop.f32.mrb[10].mxu0 }
 0x3ba   : > { %v1701_v61 = vpop.f32.mrb[11].mxu0  ;;  %v1700_v33 = vadd.f32 %v1699_v60, %v1572_v63 }
 0x3bb   : > { %v1812_v0 = vpop.f32.mrb[10].mxu1  ;;  %v1702_v2 = vadd.f32 %v1701_v61, %v1572_v63 }
 0x3bc   : > { %v1814_v62 = vpop.f32.mrb[11].mxu1  ;;  %v1813_v40 = vadd.f32 %v1812_v0, %v1572_v63  ;;  %v1859_v9 = vmax.f32 %v1700_v33, 0.0 }
 0x3bd   : > { %v1705_v45 = vpop.f32.mrb[12].mxu0  ;;  %v1815_v3 = vadd.f32 %v1814_v62, %v1572_v63  ;;  %v1860_v23 = vmax.f32 %v1702_v2, 0.0  ;;  %v1597_v63 = vpop.permute.xlu0 %1596 }
 0x3be   : > { %v1706_v46 = vadd.f32 %v1705_v45, %v1577_v44  ;;  %v1707_v7 = vpop.f32.mrb[13].mxu0  ;;  %v1861_v1 = vmax.f32 %v1813_v40, 0.0 }
 0x3bf   : > { %v1708_v6 = vadd.f32 %v1707_v7, %v1577_v44  ;;  %v1818_v27 = vpop.f32.mrb[12].mxu1  ;;  %v1862_v20 = vmax.f32 %v1815_v3, 0.0 }
 0x3c0   : > { %v1863_v10 = vmax.f32 %v1706_v46, 0.0  ;;  %v1819_v15 = vadd.f32 %v1818_v27, %v1577_v44  ;;  %v1820_v16 = vpop.f32.mrb[13].mxu1 }
 0x3c1   : > { %v1864_v19 = vmax.f32 %v1708_v6, 0.0  ;;  %v1821_v50 = vadd.f32 %v1820_v16, %v1577_v44  ;;  %v1711_v29 = vpop.f32.mrb[14].mxu0 }
 0x3c2   : > { %v2396_v4 = vpack.c.bf16 %v1863_v10, %v1859_v9  ;;  %v1865_v5 = vmax.f32 %v1819_v15, 0.0  ;;  %v1713_v38 = vpop.f32.mrb[15].mxu0  ;;  %v1712_v14 = vadd.f32 %v1711_v29, %v1582_v8 }
 0x3c3   : > { %v2394_v57 = vpack.c.bf16 %v1864_v19, %v1860_v23  ;;  %v1866_v53 = vmax.f32 %v1821_v50, 0.0  ;;  %v1824_v52 = vpop.f32.mrb[14].mxu1  ;;  %v1714_v11 = vadd.f32 %v1713_v38, %v1582_v8 }
 0x3c4   : > { %v2412_v22 = vpack.c.bf16 %v1865_v5, %v1861_v1  ;;  %v1826_v39 = vpop.f32.mrb[15].mxu1  ;;  %v1825_v25 = vadd.f32 %v1824_v52, %v1582_v8  ;;  %v1867_v31 = vmax.f32 %v1712_v14, 0.0 }
 0x3c5   : > { %v2410_v24 = vpack.c.bf16 %v1866_v53, %v1862_v20  ;;  %v1717_v13 = vpop.f32.mrb[16].mxu0  ;;  %2395 = vmatprep.subr.bf16.mxu0 %v2394_v57  ;;  %v1827_v18 = vadd.f32 %v1826_v39, %v1582_v8  ;;  %v1868_v59 = vmax.f32 %v1714_v11, 0.0 }
 0x3c6   : > { %v1718_v17 = vadd.f32 %v1717_v13, %v1587_v35  ;;  %v1719_v51 = vpop.f32.mrb[17].mxu0  ;;  %2397 = vmatpush1.bf16.msra.mxu0 %v2396_v4  ;;  %v1869_v34 = vmax.f32 %v1825_v25, 0.0  ;;  %v1602_v4 = vpop.permute.xlu1 %1601 }
 0x3c7   : > { %v1720_v56 = vadd.f32 %v1719_v51, %v1587_v35  ;;  %v1830_v26 = vpop.f32.mrb[16].mxu1  ;;  %2411 = vmatprep.subr.bf16.mxu1 %v2410_v24  ;;  %v1870_v21 = vmax.f32 %v1827_v18, 0.0 }
 0x3c8   : > { %v1871_v28 = vmax.f32 %v1718_v17, 0.0  ;;  %v1831_v54 = vadd.f32 %v1830_v26, %v1587_v35  ;;  %v1832_v58 = vpop.f32.mrb[17].mxu1  ;;  %2413 = vmatpush1.bf16.msra.mxu1 %v2412_v22  ;;  %v1607_v22 = vpop.permute.xlu0 %1606 }
 0x3c9   : > { %v1872_v32 = vmax.f32 %v1720_v56, 0.0  ;;  %v1833_v55 = vadd.f32 %v1832_v58, %v1587_v35  ;;  %v1723_v12 = vpop.f32.mrb[18].mxu0 }
 0x3ca   : > { %v2400_v30 = vpack.c.bf16 %v1871_v28, %v1867_v31  ;;  %v1873_v36 = vmax.f32 %v1831_v54, 0.0  ;;  %v1725_v37 = vpop.f32.mrb[19].mxu0  ;;  %v1724_v60 = vadd.f32 %v1723_v12, %v1592_v42 }
 0x3cb   : > { %v2398_v41 = vpack.c.bf16 %v1872_v32, %v1868_v59  ;;  %v1874_v43 = vmax.f32 %v1833_v55, 0.0  ;;  %v1836_v48 = vpop.f32.mrb[18].mxu1  ;;  %v1726_v33 = vadd.f32 %v1725_v37, %v1592_v42 }
 0x3cc   : > { %v2416_v49 = vpack.c.bf16 %v1873_v36, %v1869_v34  ;;  %v1838_v61 = vpop.f32.mrb[19].mxu1  ;;  %v1837_v44 = vadd.f32 %v1836_v48, %v1592_v42  ;;  %v1875_v3 = vmax.f32 %v1724_v60, 0.0 }
 0x3cd   : > { %v2414_v0 = vpack.c.bf16 %v1874_v43, %v1870_v21  ;;  %v1729_v62 = vpop.f32.mrb[20].mxu0  ;;  %2399 = vmatprep.subr.bf16.mxu0 %v2398_v41  ;;  %v1839_v40 = vadd.f32 %v1838_v61, %v1592_v42  ;;  %v1876_v10 = vmax.f32 %v1726_v33, 0.0  ;;  %v1891_v42 = vld [vmem:[%s3302_s12] sm:$0x3] }
 0x3ce   : > { %v1730_v2 = vadd.f32 %v1729_v62, %v1597_v63  ;;  %v1731_v45 = vpop.f32.mrb[21].mxu0  ;;  %2401 = vmatpush1.bf16.msra.mxu0 %v2400_v30  ;;  %v1877_v19 = vmax.f32 %v1837_v44, 0.0 }
 0x3cf   : > { %v1732_v46 = vadd.f32 %v1731_v45, %v1597_v63  ;;  %v1842_v7 = vpop.f32.mrb[20].mxu1  ;;  %2415 = vmatprep.subr.bf16.mxu1 %v2414_v0  ;;  %v1878_v5 = vmax.f32 %v1839_v40, 0.0 }
 0x3d0   : > { %v1879_v6 = vmax.f32 %v1730_v2, 0.0  ;;  %v1843_v27 = vadd.f32 %v1842_v7, %v1597_v63  ;;  %v1844_v9 = vpop.f32.mrb[21].mxu1  ;;  %2417 = vmatpush1.bf16.msra.mxu1 %v2416_v49 }
 0x3d1   : > { %v1880_v15 = vmax.f32 %v1732_v46, 0.0  ;;  %v1845_v16 = vadd.f32 %v1844_v9, %v1597_v63  ;;  %v1735_v23 = vpop.f32.mrb[22].mxu0 }
 0x3d2   : > { %v2404_v50 = vpack.c.bf16 %v1879_v6, %v1875_v3  ;;  %v1881_v29 = vmax.f32 %v1843_v27, 0.0  ;;  %v1737_v1 = vpop.f32.mrb[23].mxu0  ;;  %v1736_v53 = vadd.f32 %v1735_v23, %v1602_v4 }
 0x3d3   : > { %v2402_v38 = vpack.c.bf16 %v1880_v15, %v1876_v10  ;;  %v1882_v8 = vmax.f32 %v1845_v16, 0.0  ;;  %v1848_v20 = vpop.f32.mrb[22].mxu1  ;;  %v1738_v39 = vadd.f32 %v1737_v1, %v1602_v4 }
 0x3d4   : > { %v2420_v57 = vpack.c.bf16 %v1881_v29, %v1877_v19  ;;  %v1850_v52 = vpop.f32.mrb[23].mxu1  ;;  %v1849_v24 = vadd.f32 %v1848_v20, %v1602_v4  ;;  %v1883_v18 = vmax.f32 %v1736_v53, 0.0 }
 0x3d5   : > { %v2418_v14 = vpack.c.bf16 %v1882_v8, %v1878_v5  ;;  %v1741_v35 = vpop.f32.mrb[24].mxu0  ;;  %2403 = vmatprep.subr.bf16.mxu0 %v2402_v38  ;;  %v1851_v25 = vadd.f32 %v1850_v52, %v1602_v4  ;;  %v1884_v28 = vmax.f32 %v1738_v39, 0.0 }
 0x3d6   : > { %v1742_v11 = vadd.f32 %v1741_v35, %v1607_v22  ;;  %v1743_v13 = vpop.f32.mrb[25].mxu0  ;;  %2405 = vmatpush1.bf16.msra.mxu0 %v2404_v50  ;;  %v1885_v59 = vmax.f32 %v1849_v24, 0.0 }
 0x3d7   : > { %v1744_v17 = vadd.f32 %v1743_v13, %v1607_v22  ;;  %v1854_v51 = vpop.f32.mrb[24].mxu1  ;;  %2419 = vmatprep.subr.bf16.mxu1 %v2418_v14  ;;  %v1886_v12 = vmax.f32 %v1851_v25, 0.0 }
 0x3d8   : > { %v1887_v56 = vmax.f32 %v1742_v11, 0.0  ;;  %v1855_v26 = vadd.f32 %v1854_v51, %v1607_v22  ;;  %v1856_v31 = vpop.f32.mrb[25].mxu1  ;;  %2421 = vmatpush1.bf16.msra.mxu1 %v2420_v57 }
 0x3d9   : > { %v1888_v54 = vmax.f32 %v1744_v17, 0.0  ;;  %v1857_v58 = vadd.f32 %v1856_v31, %v1607_v22 }
 0x3da   : > { %v2408_v32 = vpack.c.bf16 %v1887_v56, %v1883_v18  ;;  %v1889_v55 = vmax.f32 %v1855_v26, 0.0 }
 0x3db   : > { %v2406_v34 = vpack.c.bf16 %v1888_v54, %v1884_v28  ;;  %v1890_v30 = vmax.f32 %v1857_v58, 0.0 }
 0x3dc   : > { %v2424_v36 = vpack.c.bf16 %v1889_v55, %v1885_v59 }
 0x3dd   : > { %v2422_v37 = vpack.c.bf16 %v1890_v30, %v1886_v12  ;;  %2407 = vmatprep.subr.bf16.mxu0 %v2406_v34 }
 0x3de   : > { %2409 = vmatpush1.bf16.msra.mxu0 %v2408_v32 }
 0x3df   : > { %2423 = vmatprep.subr.bf16.mxu1 %v2422_v37 }
 0x3e0   : > { %2425 = vmatpush1.bf16.msra.mxu1 %v2424_v36 }
 0x3e1   : > { %2314 = vmatmul.mubr.msk.f32.vlgmr.msra.gmra.mrb[26].mxu0 %vm955_vm0, %v1891_v42 }
 0x3e3   : > { %2315 = vmatmul.mubr.msk.f32.vlgmr.msra.gmra.mrb[26].mxu1 %vm955_vm0, %v1891_v42 }
 0x3e4   : > { %2516 = shalt.err (!%p2513_p3)
}
 0x3e5   : > { %s2517_s18 = scalar_lea.hbm %s3187_s2, 128  ;;  %s2521_s19 = scalar_lea.hbm %s3305_s15, 256 }
 0x3e6   : > { %p2518_p4 = scmp.ne.s32.totalorder %s3187_s2, %s2517_s18  ;;  %p2522_p9 = scmp.lt.u32.totalorder %s3187_s2, %s3305_s15 }
 0x3e7   : > { %p2523_p10 = scmp.lt.u32.totalorder %s2521_s19, %s2517_s18  ;;  %p2525_p12 = scmp.lt.u32.totalorder %s2517_s18, %s3187_s2 }
 0x3e8   : > { %p2519_p7 = pnand %p2518_p4, %p2759_p5 }
 0x3e9   : > { %p2524_p11 = por %p2523_p10, %p2522_p9 }
 0x3ea   : > { %p2520_p8 = pneg %p2519_p7 }
 0x3eb   : > { %p2526_p13 = por %p2525_p12, %p2524_p11 }
 0x3ed   : > { %p2527_p0 = pnand %p2526_p13, %p2520_p8 }
 0x3ef   : > { %2530 = shalt.err (!%p2527_p0)
}
 0x3f0   : > { %2427 = dma.vmem_to_hbm [thread:$0]  (%p2759_p5), %s2132_s30, 128, %s3187_s2, %s3191_s26  }
 0x3f1   : > { %s3215_s4 = scalar_lea.hbm %s3306_s16, %s3181_s20  ;;  %s3329_s29 = scalar_lea.vmem [#allocation6], %s3091_s28 }
 0x3f2   : > { %s2145_s19 = sshll.u32 %s3329_s29, 4  ;;  %s2632_s23 = smov [#allocation6]   ;;  %s2146_s19 = int_to_ptr.vmem [resolvable:$true] %s2145_s19 }
 0x3f3   : > { %s2531_s18 = scalar_lea.vmem %s2146_s19, 128  ;;  %s2535_s1 = sshll.u32 %s2632_s23, 4  ;;  %s2536_s1 = int_to_ptr.vmem [resolvable:$false] %s2535_s1 }
 0x3f4   : > { %p2532_p1 = scmp.ne.s32.totalorder %s2146_s19, %s2531_s18  ;;  %s2537_s5 = scalar_lea.vmem %s2536_s1, 256 }
 0x3f5   : > { %p2538_p4 = scmp.lt.s32.totalorder %s2146_s19, %s2536_s1  ;;  %p2539_p7 = scmp.lt.s32.totalorder %s2537_s5, %s2531_s18 }
 0x3f6   : > { %p2533_p2 = pnand %p2532_p1, %p2759_p5 }
 0x3f7   : > { %p2540_p8 = por %p2539_p7, %p2538_p4 }
 0x3f8   : > { %p2534_p3 = pneg %p2533_p2 }
 0x3fa   : > { %p2541_p9 = pnand %p2540_p8, %p2534_p3 }
 0x3fc   : > { %2544 = shalt.err (!%p2541_p9)
}
 0x3fd   : > { %s2545_s30 = scalar_lea.hbm %s3215_s4, 128  ;;  %s2549_s25 = scalar_lea.hbm %s3306_s16, 256 }
 0x3fe   : > { %p2546_p10 = scmp.ne.s32.totalorder %s3215_s4, %s2545_s30  ;;  %p2550_p13 = scmp.lt.u32.totalorder %s3215_s4, %s3306_s16 }
 0x3ff   : > { %p2551_p0 = scmp.lt.u32.totalorder %s2549_s25, %s2545_s30  ;;  %p2553_p2 = scmp.lt.u32.totalorder %s2545_s30, %s3215_s4 }
 0x400   : > { %p2547_p11 = pnand %p2546_p10, %p2759_p5 }
 0x401   : > { %p2552_p1 = por %p2551_p0, %p2550_p13 }
 0x402   : > { %p2548_p12 = pneg %p2547_p11 }
 0x403   : > { %p2554_p3 = por %p2553_p2, %p2552_p1 }
 0x405   : > { %p2555_p4 = pnand %p2554_p3, %p2548_p12 }
 0x407   : > { %2558 = shalt.err (!%p2555_p4)
}
 0x408   : > { %2428 = dma.vmem_to_hbm [thread:$0]  (%p2759_p5), %s2146_s19, 128, %s3215_s4, %s3191_s26   ;;  %v1896_v21 = vpop.permute.xlu1 %1895 }
 0x409   : > { %s535_s5 = scalar_lea.vmem [#allocation2], %s3091_s28  ;;  %s3244_s19 = scalar_lea.hbm %s3304_s14, %s3181_s20 }
 0x40a   : > { %s2117_s18 = sshll.u32 %s535_s5, 4  ;;  %s3330_s1 = sand.u32 1, %s2617_s22   ;;  %s3246_s18 = int_to_ptr.vmem [resolvable:$true] %s2117_s18 }
 0x40b   : > { %s2093_s30 = scalar_lea.sflag [#allocation3], %s3330_s1  ;;  %s2559_s28 = scalar_lea.vmem %s3246_s18, 128 }
 0x40c   : > { %p2560_p7 = scmp.ne.s32.totalorder %s3246_s18, %s2559_s28  ;;  %s2633_s2 = smov [#allocation2]  }
 0x40d   : > { %s2563_s3 = sshll.u32 %s2633_s2, 4  ;;  %s2564_s3 = int_to_ptr.vmem [resolvable:$false] %s2563_s3 }
 0x40e   : > { %p2561_p8 = pnand %p2560_p7, %p2759_p5  ;;  %s2565_s25 = scalar_lea.vmem %s2564_s3, 256 }
 0x40f   : > { %p2566_p10 = scmp.lt.s32.totalorder %s3246_s18, %s2564_s3  ;;  %p2567_p11 = scmp.lt.s32.totalorder %s2565_s25, %s2559_s28 }
 0x410   : > { %p2562_p9 = pneg %p2561_p8 }
 0x411   : > { %p2568_p12 = por %p2567_p11, %p2566_p10 }
 0x413   : > { %p2569_p13 = pnand %p2568_p12, %p2562_p9 }
 0x4b4   : > { %v1967_v41 = vpop.f32.mrb[26].mxu0 }
 0x4b5   : > { %v1968_v43 = vadd.f32 %v1967_v41, %v1896_v21  ;;  %v1969_v48 = vpop.f32.mrb[27].mxu0 }
 0x4b6   : > { %v1970_v49 = vadd.f32 %v1969_v48, %v1896_v21  ;;  %v2038_v60 = vpop.f32.mrb[26].mxu1 }
 0x4b7   : > { %v2039_v61 = vadd.f32 %v2038_v60, %v1896_v21  ;;  %v2040_v63 = vpop.f32.mrb[27].mxu1 }
 0x4b8   : > { %v2047_v0 = vcombine.low %v1968_v43, %v1970_v49  ;;  %v2041_v33 = vadd.f32 %v2040_v63, %v1896_v21 }
 0x4ba   : > { %v2048_v62 = vcombine.low %v2039_v61, %v2041_v33  ;;  %v2055_v44 = vrot.slane %v2047_v0, %v3087_v47 }
 0x4bc   : > { %v2062_v2 = vrot.slane %v2048_v62, %v3087_v47 }
 0x4be   : > { %v2063_v45 = vcombine.low %v2055_v44, %v2062_v2 }
 0x4c0   : > { %2065 = vst [vmem:[%s535_s5] sm:$0xff] %v2063_v45 }
 0x4c1   : > { %2572 = shalt.err (!%p2569_p13)
}
 0x4c2   : > { %s2573_s20 = scalar_lea.hbm %s3244_s19, 128  ;;  %s2577_s5 = scalar_lea.hbm %s3304_s14, 256 }
 0x4c3   : > { %p2574_p0 = scmp.ne.s32.totalorder %s3244_s19, %s2573_s20  ;;  %p2578_p3 = scmp.lt.u32.totalorder %s3244_s19, %s3304_s14 }
 0x4c4   : > { %p2579_p4 = scmp.lt.u32.totalorder %s2577_s5, %s2573_s20  ;;  %p2581_p8 = scmp.lt.u32.totalorder %s2573_s20, %s3244_s19 }
 0x4c5   : > { %p2575_p1 = pnand %p2574_p0, %p2759_p5 }
 0x4c6   : > { %p2580_p7 = por %p2579_p4, %p2578_p3 }
 0x4c7   : > { %p2576_p2 = pneg %p2575_p1 }
 0x4c8   : > { %p2582_p9 = por %p2581_p8, %p2580_p7 }
 0x4ca   : > { %p2583_p10 = pnand %p2582_p9, %p2576_p2 }
 0x4cc   : > { %2586 = shalt.err (!%p2583_p10)
}
 0x4cd   : > { %2426 = dma.vmem_to_hbm [thread:$0]  (%p2759_p5), %s3246_s18, 128, %s3244_s19, %s2093_s30  }
 0x4ce PF: > { %p2442_p11 = scmp.ge.s32.totalorder %s2625_s24, 2  ;;  %s2157_s1 = sand.u32 1, %s2613_s21  }
 0x4cf   : > { %s2158_s28 = scalar_lea.sflag [#allocation3], %s2157_s1 }
 0x4d0   : > { %p2433_p12 = pnand %p2442_p11, %p2763_p6 }
 0x4d2   : > { %2604 = dma.done.wait (!%p2433_p12), %s2158_s28, 128  }
 0x4d3   : > { %2606 = vsyncadd (!%p2433_p12), %s2158_s28, 4294967168  ;;  %s3331_s2 = sadd.s32 4294967294, %s2625_s24  }
 0x4d4   : > { %s2166_s3 = sand.u32 1, %s3331_s2  }
 0x4d5   : > { %s2167_s25 = scalar_lea.sflag [#allocation5], %s2166_s3 }
 0x4d6   : > { %2608 = dma.done.wait (!%p2433_p12), %s2167_s25, 256  }
 0x4d7   : > { %2610 = vsyncadd (!%p2433_p12), %s2167_s25, 4294967040  ;;  %s3332_s0 = sld [smem:[#allocation9_spill]]  ;;  %s3333_s23 = sld [smem:[#allocation10_spill]] }
 0x4d8   : > { %p30_p5 = scmp.ge.s32.totalorder %s2744_s27, 4   ;;  %s3334_s21 = smov %s2617_s22 }
 0x4d9   : > { %s3336_s24 = smov %s2744_s27 }
 0x4da   :  { %32 = sbr.rel (!%p30_p5) target bundleno = 12 (0xc), region = 146 }
 0x4dd   : > { %s3335_s22 = smov %s3332_s0 }
 0x4e1   :  { %2181 = vsyncpa [#allocation3], 1 }
 0x4e2   :  { %2183 = vsyncpa [#allocation3 + $0x1], 1 }
 0x4e3   :  { %2184 = vsyncpa [#allocation5], 1 }
 0x4e4   :  { %2186 = vsyncpa [#allocation5 + $0x1], 1 }

</bundles_post_ra>
